<compile_context>
chip_gen: v5e
topology: v5e:2x2
jax: 0.10.0
libtpu: 0.0.40
codegen_flags: <defaults>
</compile_context>

<pallas_src>
import numpy as np
import jax
import jax.numpy as jnp
from jax.experimental import pallas as pl
from jax.experimental.pallas import tpu as pltpu

SUB = 8      # sublanes per f32 vreg
LANE = 128   # lanes per vreg


def _tile(x, shape):
    """Broadcast a (possibly scalar) value to a full (SUB, LANE) f32 tile."""
    return jnp.broadcast_to(jnp.asarray(x, jnp.float32), shape)


def fk_kernel(params_ref, theta_ref, out_ref):
    # params_ref : SMEM f32[39] = [d(6), r(6), cos_alpha(6), sin_alpha(6),
    #                              theta_offset(6), R_we_ee row-major(9)]
    # theta_ref  : VMEM f32[6, T, 128]   joint index on dim0, batch on (sublane, lane)
    # out_ref    : VMEM f32[12, T, 128]  rows 0..2 = pos, rows 3..11 = rot (row-major)
    n_inner = theta_ref.shape[1] // SUB

    d   = [params_ref[i]      for i in range(6)]
    r   = [params_ref[6 + i]  for i in range(6)]
    ca  = [params_ref[12 + i] for i in range(6)]
    sa  = [params_ref[18 + i] for i in range(6)]
    off = [params_ref[24 + i] for i in range(6)]
    Ree = [params_ref[30 + i] for i in range(9)]   # constant wrist->EE rotation

    def compose(R, t, d_i, r_i, ca_i, sa_i, ct, st):
        # T_new = T_old(R, t) @ DH(d_i, r_i, alpha_i, theta_i), carried as
        # rotation (9) + translation (3).  DH rotation columns:
        #   col0 = [ct, ca*st, sa*st], col1 = [-st, ca*ct, sa*ct], col2 = [0, -sa, ca]
        #   t_dh = [r, -d*sa, d*ca]
        ps1 = -d_i * sa_i          # scalar
        ps2 = d_i * ca_i           # scalar
        Rn = [None] * 9
        tn = [None] * 3
        for j in range(3):
            a, b, c = R[3 * j + 0], R[3 * j + 1], R[3 * j + 2]
            u = ca_i * b + sa_i * c
            Rn[3 * j + 0] = ct * a + st * u
            Rn[3 * j + 1] = ct * u - st * a
            Rn[3 * j + 2] = ca_i * c - sa_i * b
            tn[j] = r_i * a + ps1 * b + ps2 * c + t[j]
        return Rn, tn

    def compute_subtile(row):
        tshape = (SUB, LANE)
        th = [theta_ref[j, pl.ds(row, SUB), :] - off[j] for j in range(6)]
        ct = [jnp.cos(x) for x in th]
        st = [jnp.sin(x) for x in th]

        # Link 0: DH(d0, r=0, alpha=0) = [[c,-s,0,0],[s,c,0,0],[0,0,1,d0],[0,0,0,1]].
        # Constant entries stay Python scalars so scalar-only products are free.
        R = [ct[0], -st[0], 0.0,
             st[0],  ct[0], 0.0,
             0.0,    0.0,   1.0]
        t = [0.0, 0.0, d[0]]

        # Links 1..5 (module indexing: d[i+1] with r[i]/alpha[i], theta[:, i+1]).
        for i in range(5):
            R, t = compose(R, t, d[i + 1], r[i], ca[i], sa[i],
                           ct[i + 1], st[i + 1])

        # Constant wrist->EE rotation: R = R @ Ree; translation unchanged
        # (M's 4th column is [0,0,0,1]).
        Rf = [None] * 9
        for i in range(3):
            for j in range(3):
                Rf[3 * i + j] = (R[3 * i + 0] * Ree[j]
                                 + R[3 * i + 1] * Ree[3 + j]
                                 + R[3 * i + 2] * Ree[6 + j])

        # Fused epilogue: 12 full (8,128) aligned tile stores into one output.
        out_ref[0, pl.ds(row, SUB), :] = _tile(t[0], tshape)
        out_ref[1, pl.ds(row, SUB), :] = _tile(t[1], tshape)
        out_ref[2, pl.ds(row, SUB), :] = _tile(t[2], tshape)
        for k in range(9):
            out_ref[3 + k, pl.ds(row, SUB), :] = _tile(Rf[k], tshape)

    if n_inner == 1:
        compute_subtile(0)
    else:
        @pl.loop(0, n_inner)
        def _(s):
            compute_subtile(pl.multiple_of(s * SUB, SUB))


def fk_forward(theta, d, r, alpha, theta_offset, euler_we_ee, *, max_inner=4):
    """theta: (B, 6) float32 -> (pos (B, 3), rot (B, 3, 3))."""
    B = theta.shape[0]
    chunk = SUB * LANE                       # 1024 batch elements per sub-tile
    n_chunks = max(1, pl.cdiv(B, chunk))
    # Amortize per-grid-step overhead over up to max_inner sub-tiles, but keep
    # at least 2 parallel grid steps when possible (v7x has 2 TensorCores).
    n_inner = max(1, min(max_inner, n_chunks // 2)) if n_chunks > 1 else 1
    n_blocks = pl.cdiv(n_chunks, n_inner)
    tile_sub = n_inner * SUB
    rows = n_blocks * tile_sub
    Bp = rows * LANE

    # Lane-major layout plumbing (fuses into surrounding jit when used hot).
    theta_t = jnp.zeros((6, Bp), jnp.float32).at[:, :B].set(
        theta.astype(jnp.float32).T).reshape(6, rows, LANE)

    d32 = d.astype(jnp.float32)
    r32 = r.astype(jnp.float32)
    a32 = alpha.astype(jnp.float32)
    o32 = theta_offset.astype(jnp.float32)
    e32 = euler_we_ee.astype(jnp.float32)

    # Precompute all constant transcendentals on the host.
    cos_a, sin_a = jnp.cos(a32), jnp.sin(a32)
    ce, se = jnp.cos(e32), jnp.sin(e32)
    R1 = jnp.array([[ce[0], -se[0], 0.0], [se[0], ce[0], 0.0], [0.0, 0.0, 1.0]],
                   jnp.float32)
    R2 = jnp.array([[ce[1], 0.0, se[1]], [0.0, 1.0, 0.0], [-se[1], 0.0, ce[1]]],
                   jnp.float32)
    R3 = jnp.array([[1.0, 0.0, 0.0], [0.0, ce[2], -se[2]], [0.0, se[2], ce[2]]],
                   jnp.float32)
    Ree = (R3 @ R2 @ R1).reshape(9)

    params = jnp.concatenate([d32, r32, cos_a, sin_a, o32, Ree])  # f32[39]

    out = pl.pallas_call(
        fk_kernel,
        out_shape=jax.ShapeDtypeStruct((12, rows, LANE), jnp.float32),
        grid=(n_blocks,),
        in_specs=[
            pl.BlockSpec(memory_space=pltpu.MemorySpace.SMEM),        # params
            pl.BlockSpec((6, tile_sub, LANE), lambda i: (0, i, 0)),   # theta
        ],
        out_specs=pl.BlockSpec((12, tile_sub, LANE), lambda i: (0, i, 0)),
        compiler_params=pltpu.CompilerParams(
            dimension_semantics=("parallel",)),
    )(params, theta_t)

    out = out.reshape(12, Bp)[:, :B]
    pos = out[:3].T                         # (B, 3)
    rot = out[3:].T.reshape(B, 3, 3)        # (B, 3, 3), row-major
    return pos, rot


# --- pure-JAX reference (mirrors the PyTorch module) for validation ---------
def _ref_dh(d_i, r_i, alpha_i, th):
    ct, st = jnp.cos(th), jnp.sin(th)
    o = jnp.ones_like(th)
    z = jnp.zeros_like(th)
    ca = jnp.cos(alpha_i) * o
    sa = jnp.sin(alpha_i) * o
    row1 = jnp.stack([ct, -st, z, r_i * o], axis=1)
    row2 = jnp.stack([ca * st, ca * ct, -sa, -d_i * sa], axis=1)
    row3 = jnp.stack([sa * st, sa * ct, ca, d_i * ca], axis=1)
    row4 = jnp.stack([z, z, z, o], axis=1)
    return jnp.stack([row1, row2, row3, row4], axis=1)


def fk_reference(theta, d, r, alpha, off, eu):
    T = _ref_dh(d[0], 0.0, 0.0, theta[:, 0] - off[0])
    for i in range(5):
        T = T @ _ref_dh(d[i + 1], r[i], alpha[i], theta[:, i + 1] - off[i + 1])
    c, s = jnp.cos(eu), jnp.sin(eu)
    R1 = jnp.array([[c[0], -s[0], 0.0], [s[0], c[0], 0.0], [0.0, 0.0, 1.0]])
    R2 = jnp.array([[c[1], 0.0, s[1]], [0.0, 1.0, 0.0], [-s[1], 0.0, c[1]]])
    R3 = jnp.array([[1.0, 0.0, 0.0], [0.0, c[2], -s[2]], [0.0, s[2], c[2]]])
    M = jnp.eye(4, dtype=jnp.float32).at[:3, :3].set(R3 @ R2 @ R1)
    T = T @ M
    return T[:, :3, 3], T[:, :3, :3]


if __name__ == "__main__":
    # Deterministic parameters (exactly the FK.__init__ values, UR5 DH table).
    d = jnp.array([0.089159, 0.0, 0.0, 0.10915, 0.09465, 0.0823], jnp.float32)
    r = jnp.array([0.0, -0.425, -0.39225, 0.0, 0.0, 0.0], jnp.float32)
    alpha = jnp.array([0.5 * np.pi, 0.0, 0.0, 0.5 * np.pi, -0.5 * np.pi, 0.0],
                      jnp.float32)
    theta_offset = jnp.array([np.pi, 0.0, 0.0, 0.0, 0.0, 0.0], jnp.float32)
    euler_we_ee = jnp.array([0.5 * np.pi, 0.0, 0.5 * np.pi], jnp.float32)

    key = jax.random.PRNGKey(0)

    # Small batch (single sub-tile, grid of 1).
    B = 8
    theta = jax.random.uniform(key, (B, 6), jnp.float32,
                               minval=-np.pi, maxval=np.pi)
    pos, rot = fk_forward(theta, d, r, alpha, theta_offset, euler_we_ee)
    pos = jax.block_until_ready(pos)
    rot = jax.block_until_ready(rot)
    pos_ref, rot_ref = fk_reference(theta, d, r, alpha, theta_offset,
                                    euler_we_ee)
    assert pos.shape == (B, 3) and rot.shape == (B, 3, 3)
    np.testing.assert_allclose(np.asarray(pos), np.asarray(pos_ref),
                               rtol=3e-5, atol=3e-5)
    np.testing.assert_allclose(np.asarray(rot), np.asarray(rot_ref),
                               rtol=3e-5, atol=3e-5)

    # Larger batch: exercises the multi-block grid and the in-kernel sub-tile loop.
    B2 = 4100
    theta2 = jax.random.uniform(jax.random.PRNGKey(1), (B2, 6), jnp.float32,
                                minval=-np.pi, maxval=np.pi)
    pos2, rot2 = fk_forward(theta2, d, r, alpha, theta_offset, euler_we_ee)
    pos2 = jax.block_until_ready(pos2)
    rot2 = jax.block_until_ready(rot2)
    pos2_ref, rot2_ref = fk_reference(theta2, d, r, alpha, theta_offset,
                                      euler_we_ee)
    np.testing.assert_allclose(np.asarray(pos2), np.asarray(pos2_ref),
                               rtol=3e-5, atol=3e-5)
    np.testing.assert_allclose(np.asarray(rot2), np.asarray(rot2_ref),
                               rtol=3e-5, atol=3e-5)

    print("KERNEL_OK")
</pallas_src>

<mosaic_0001>
module attributes {stable_mosaic.version = 11 : i64} {
  func.func @fk_kernel(%arg0: i32, %arg1: memref<39xf32, #tpu.memory_space<smem>>, %arg2: memref<6x8x128xf32, #tpu.memory_space<vmem>>, %arg3: memref<12x8x128xf32, #tpu.memory_space<vmem>>) attributes {dimension_semantics = [#tpu.dimension_semantics<parallel>], iteration_bounds = array<i64: 1>, scalar_prefetch = 0 : i64, scratch_operands = 0 : i64, tpu.core_type = #tpu.core_type<tc>, window_params = [{transform_indices = @transform_0, window_bounds = array<i64: 39>}, {transform_indices = @transform_1, window_bounds = array<i64: 6, 8, 128>}, {transform_indices = @transform_2, window_bounds = array<i64: 12, 8, 128>}]} {
    %c0 = arith.constant 0 : index
    %0 = memref.load %arg1[%c0] : memref<39xf32, #tpu.memory_space<smem>>
    %c1 = arith.constant 1 : index
    %1 = memref.load %arg1[%c1] : memref<39xf32, #tpu.memory_space<smem>>
    %c2 = arith.constant 2 : index
    %2 = memref.load %arg1[%c2] : memref<39xf32, #tpu.memory_space<smem>>
    %c3 = arith.constant 3 : index
    %3 = memref.load %arg1[%c3] : memref<39xf32, #tpu.memory_space<smem>>
    %c4 = arith.constant 4 : index
    %4 = memref.load %arg1[%c4] : memref<39xf32, #tpu.memory_space<smem>>
    %c5 = arith.constant 5 : index
    %5 = memref.load %arg1[%c5] : memref<39xf32, #tpu.memory_space<smem>>
    %c6 = arith.constant 6 : index
    %6 = memref.load %arg1[%c6] : memref<39xf32, #tpu.memory_space<smem>>
    %c7 = arith.constant 7 : index
    %7 = memref.load %arg1[%c7] : memref<39xf32, #tpu.memory_space<smem>>
    %c8 = arith.constant 8 : index
    %8 = memref.load %arg1[%c8] : memref<39xf32, #tpu.memory_space<smem>>
    %c9 = arith.constant 9 : index
    %9 = memref.load %arg1[%c9] : memref<39xf32, #tpu.memory_space<smem>>
    %c10 = arith.constant 10 : index
    %10 = memref.load %arg1[%c10] : memref<39xf32, #tpu.memory_space<smem>>
    %c12 = arith.constant 12 : index
    %11 = memref.load %arg1[%c12] : memref<39xf32, #tpu.memory_space<smem>>
    %c13 = arith.constant 13 : index
    %12 = memref.load %arg1[%c13] : memref<39xf32, #tpu.memory_space<smem>>
    %c14 = arith.constant 14 : index
    %13 = memref.load %arg1[%c14] : memref<39xf32, #tpu.memory_space<smem>>
    %c15 = arith.constant 15 : index
    %14 = memref.load %arg1[%c15] : memref<39xf32, #tpu.memory_space<smem>>
    %c16 = arith.constant 16 : index
    %15 = memref.load %arg1[%c16] : memref<39xf32, #tpu.memory_space<smem>>
    %c18 = arith.constant 18 : index
    %16 = memref.load %arg1[%c18] : memref<39xf32, #tpu.memory_space<smem>>
    %c19 = arith.constant 19 : index
    %17 = memref.load %arg1[%c19] : memref<39xf32, #tpu.memory_space<smem>>
    %c20 = arith.constant 20 : index
    %18 = memref.load %arg1[%c20] : memref<39xf32, #tpu.memory_space<smem>>
    %c21 = arith.constant 21 : index
    %19 = memref.load %arg1[%c21] : memref<39xf32, #tpu.memory_space<smem>>
    %c22 = arith.constant 22 : index
    %20 = memref.load %arg1[%c22] : memref<39xf32, #tpu.memory_space<smem>>
    %c24 = arith.constant 24 : index
    %21 = memref.load %arg1[%c24] : memref<39xf32, #tpu.memory_space<smem>>
    %c25 = arith.constant 25 : index
    %22 = memref.load %arg1[%c25] : memref<39xf32, #tpu.memory_space<smem>>
    %c26 = arith.constant 26 : index
    %23 = memref.load %arg1[%c26] : memref<39xf32, #tpu.memory_space<smem>>
    %c27 = arith.constant 27 : index
    %24 = memref.load %arg1[%c27] : memref<39xf32, #tpu.memory_space<smem>>
    %c28 = arith.constant 28 : index
    %25 = memref.load %arg1[%c28] : memref<39xf32, #tpu.memory_space<smem>>
    %c29 = arith.constant 29 : index
    %26 = memref.load %arg1[%c29] : memref<39xf32, #tpu.memory_space<smem>>
    %c30 = arith.constant 30 : index
    %27 = memref.load %arg1[%c30] : memref<39xf32, #tpu.memory_space<smem>>
    %c31 = arith.constant 31 : index
    %28 = memref.load %arg1[%c31] : memref<39xf32, #tpu.memory_space<smem>>
    %c32 = arith.constant 32 : index
    %29 = memref.load %arg1[%c32] : memref<39xf32, #tpu.memory_space<smem>>
    %c33 = arith.constant 33 : index
    %30 = memref.load %arg1[%c33] : memref<39xf32, #tpu.memory_space<smem>>
    %c34 = arith.constant 34 : index
    %31 = memref.load %arg1[%c34] : memref<39xf32, #tpu.memory_space<smem>>
    %c35 = arith.constant 35 : index
    %32 = memref.load %arg1[%c35] : memref<39xf32, #tpu.memory_space<smem>>
    %c36 = arith.constant 36 : index
    %33 = memref.load %arg1[%c36] : memref<39xf32, #tpu.memory_space<smem>>
    %c37 = arith.constant 37 : index
    %34 = memref.load %arg1[%c37] : memref<39xf32, #tpu.memory_space<smem>>
    %c38 = arith.constant 38 : index
    %35 = memref.load %arg1[%c38] : memref<39xf32, #tpu.memory_space<smem>>
    %c0_0 = arith.constant 0 : index
    %c0_1 = arith.constant 0 : index
    %c0_2 = arith.constant 0 : index
    %36 = vector.load %arg2[%c0_0, %c0_1, %c0_2] : memref<6x8x128xf32, #tpu.memory_space<vmem>>, vector<1x8x128xf32>
    %37 = vector.shape_cast %36 : vector<1x8x128xf32> to vector<8x128xf32>
    %38 = vector.broadcast %21 : f32 to vector<8x128xf32>
    %39 = arith.subf %37, %38 : vector<8x128xf32>
    %c1_3 = arith.constant 1 : index
    %c0_4 = arith.constant 0 : index
    %c0_5 = arith.constant 0 : index
    %40 = vector.load %arg2[%c1_3, %c0_4, %c0_5] : memref<6x8x128xf32, #tpu.memory_space<vmem>>, vector<1x8x128xf32>
    %41 = vector.shape_cast %40 : vector<1x8x128xf32> to vector<8x128xf32>
    %42 = vector.broadcast %22 : f32 to vector<8x128xf32>
    %43 = arith.subf %41, %42 : vector<8x128xf32>
    %c2_6 = arith.constant 2 : index
    %c0_7 = arith.constant 0 : index
    %c0_8 = arith.constant 0 : index
    %44 = vector.load %arg2[%c2_6, %c0_7, %c0_8] : memref<6x8x128xf32, #tpu.memory_space<vmem>>, vector<1x8x128xf32>
    %45 = vector.shape_cast %44 : vector<1x8x128xf32> to vector<8x128xf32>
    %46 = vector.broadcast %23 : f32 to vector<8x128xf32>
    %47 = arith.subf %45, %46 : vector<8x128xf32>
    %c3_9 = arith.constant 3 : index
    %c0_10 = arith.constant 0 : index
    %c0_11 = arith.constant 0 : index
    %48 = vector.load %arg2[%c3_9, %c0_10, %c0_11] : memref<6x8x128xf32, #tpu.memory_space<vmem>>, vector<1x8x128xf32>
    %49 = vector.shape_cast %48 : vector<1x8x128xf32> to vector<8x128xf32>
    %50 = vector.broadcast %24 : f32 to vector<8x128xf32>
    %51 = arith.subf %49, %50 : vector<8x128xf32>
    %c4_12 = arith.constant 4 : index
    %c0_13 = arith.constant 0 : index
    %c0_14 = arith.constant 0 : index
    %52 = vector.load %arg2[%c4_12, %c0_13, %c0_14] : memref<6x8x128xf32, #tpu.memory_space<vmem>>, vector<1x8x128xf32>
    %53 = vector.shape_cast %52 : vector<1x8x128xf32> to vector<8x128xf32>
    %54 = vector.broadcast %25 : f32 to vector<8x128xf32>
    %55 = arith.subf %53, %54 : vector<8x128xf32>
    %c5_15 = arith.constant 5 : index
    %c0_16 = arith.constant 0 : index
    %c0_17 = arith.constant 0 : index
    %56 = vector.load %arg2[%c5_15, %c0_16, %c0_17] : memref<6x8x128xf32, #tpu.memory_space<vmem>>, vector<1x8x128xf32>
    %57 = vector.shape_cast %56 : vector<1x8x128xf32> to vector<8x128xf32>
    %58 = vector.broadcast %26 : f32 to vector<8x128xf32>
    %59 = arith.subf %57, %58 : vector<8x128xf32>
    %60 = math.cos %39 : vector<8x128xf32>
    %61 = math.cos %43 : vector<8x128xf32>
    %62 = math.cos %47 : vector<8x128xf32>
    %63 = math.cos %51 : vector<8x128xf32>
    %64 = math.cos %55 : vector<8x128xf32>
    %65 = math.cos %59 : vector<8x128xf32>
    %66 = math.sin %39 : vector<8x128xf32>
    %67 = math.sin %43 : vector<8x128xf32>
    %68 = math.sin %47 : vector<8x128xf32>
    %69 = math.sin %51 : vector<8x128xf32>
    %70 = math.sin %55 : vector<8x128xf32>
    %71 = math.sin %59 : vector<8x128xf32>
    %cst = arith.constant 0.000000e+00 : f32
    %72 = vector.broadcast %cst : f32 to vector<8x128xf32>
    %73 = arith.subf %72, %66 : vector<8x128xf32>
    %cst_18 = arith.constant 0.000000e+00 : f32
    %74 = arith.subf %cst_18, %1 : f32
    %75 = arith.mulf %74, %16 : f32
    %76 = arith.mulf %1, %11 : f32
    %77 = vector.broadcast %11 : f32 to vector<8x128xf32>
    %78 = arith.mulf %77, %73 : vector<8x128xf32>
    %cst_19 = arith.constant 0.000000e+00 : f32
    %79 = arith.mulf %16, %cst_19 : f32
    %80 = vector.broadcast %79 : f32 to vector<8x128xf32>
    %81 = arith.addf %78, %80 : vector<8x128xf32>
    %82 = arith.mulf %61, %60 : vector<8x128xf32>
    %83 = arith.mulf %67, %81 : vector<8x128xf32>
    %84 = arith.addf %82, %83 : vector<8x128xf32>
    %85 = arith.mulf %61, %81 : vector<8x128xf32>
    %86 = arith.mulf %67, %60 : vector<8x128xf32>
    %87 = arith.subf %85, %86 : vector<8x128xf32>
    %cst_20 = arith.constant 0.000000e+00 : f32
    %88 = arith.mulf %11, %cst_20 : f32
    %89 = vector.broadcast %16 : f32 to vector<8x128xf32>
    %90 = arith.mulf %89, %73 : vector<8x128xf32>
    %91 = vector.broadcast %88 : f32 to vector<8x128xf32>
    %92 = arith.subf %91, %90 : vector<8x128xf32>
    %93 = vector.broadcast %6 : f32 to vector<8x128xf32>
    %94 = arith.mulf %93, %60 : vector<8x128xf32>
    %95 = vector.broadcast %75 : f32 to vector<8x128xf32>
    %96 = arith.mulf %95, %73 : vector<8x128xf32>
    %97 = arith.addf %94, %96 : vector<8x128xf32>
    %cst_21 = arith.constant 0.000000e+00 : f32
    %98 = arith.mulf %76, %cst_21 : f32
    %99 = vector.broadcast %98 : f32 to vector<8x128xf32>
    %100 = arith.addf %97, %99 : vector<8x128xf32>
    %cst_22 = arith.constant 0.000000e+00 : f32
    %101 = vector.broadcast %cst_22 : f32 to vector<8x128xf32>
    %102 = arith.addf %100, %101 : vector<8x128xf32>
    %103 = vector.broadcast %11 : f32 to vector<8x128xf32>
    %104 = arith.mulf %103, %60 : vector<8x128xf32>
    %cst_23 = arith.constant 0.000000e+00 : f32
    %105 = arith.mulf %16, %cst_23 : f32
    %106 = vector.broadcast %105 : f32 to vector<8x128xf32>
    %107 = arith.addf %104, %106 : vector<8x128xf32>
    %108 = arith.mulf %61, %66 : vector<8x128xf32>
    %109 = arith.mulf %67, %107 : vector<8x128xf32>
    %110 = arith.addf %108, %109 : vector<8x128xf32>
    %111 = arith.mulf %61, %107 : vector<8x128xf32>
    %112 = arith.mulf %67, %66 : vector<8x128xf32>
    %113 = arith.subf %111, %112 : vector<8x128xf32>
    %cst_24 = arith.constant 0.000000e+00 : f32
    %114 = arith.mulf %11, %cst_24 : f32
    %115 = vector.broadcast %16 : f32 to vector<8x128xf32>
    %116 = arith.mulf %115, %60 : vector<8x128xf32>
    %117 = vector.broadcast %114 : f32 to vector<8x128xf32>
    %118 = arith.subf %117, %116 : vector<8x128xf32>
    %119 = vector.broadcast %6 : f32 to vector<8x128xf32>
    %120 = arith.mulf %119, %66 : vector<8x128xf32>
    %121 = vector.broadcast %75 : f32 to vector<8x128xf32>
    %122 = arith.mulf %121, %60 : vector<8x128xf32>
    %123 = arith.addf %120, %122 : vector<8x128xf32>
    %cst_25 = arith.constant 0.000000e+00 : f32
    %124 = arith.mulf %76, %cst_25 : f32
    %125 = vector.broadcast %124 : f32 to vector<8x128xf32>
    %126 = arith.addf %123, %125 : vector<8x128xf32>
    %cst_26 = arith.constant 0.000000e+00 : f32
    %127 = vector.broadcast %cst_26 : f32 to vector<8x128xf32>
    %128 = arith.addf %126, %127 : vector<8x128xf32>
    %cst_27 = arith.constant 0.000000e+00 : f32
    %129 = arith.mulf %11, %cst_27 : f32
    %cst_28 = arith.constant 1.000000e+00 : f32
    %130 = arith.mulf %16, %cst_28 : f32
    %131 = arith.addf %129, %130 : f32
    %cst_29 = arith.constant 0.000000e+00 : f32
    %132 = vector.broadcast %cst_29 : f32 to vector<8x128xf32>
    %133 = arith.mulf %61, %132 : vector<8x128xf32>
    %134 = vector.broadcast %131 : f32 to vector<8x128xf32>
    %135 = arith.mulf %67, %134 : vector<8x128xf32>
    %136 = arith.addf %133, %135 : vector<8x128xf32>
    %137 = vector.broadcast %131 : f32 to vector<8x128xf32>
    %138 = arith.mulf %61, %137 : vector<8x128xf32>
    %cst_30 = arith.constant 0.000000e+00 : f32
    %139 = vector.broadcast %cst_30 : f32 to vector<8x128xf32>
    %140 = arith.mulf %67, %139 : vector<8x128xf32>
    %141 = arith.subf %138, %140 : vector<8x128xf32>
    %cst_31 = arith.constant 1.000000e+00 : f32
    %142 = arith.mulf %11, %cst_31 : f32
    %cst_32 = arith.constant 0.000000e+00 : f32
    %143 = arith.mulf %16, %cst_32 : f32
    %144 = arith.subf %142, %143 : f32
    %cst_33 = arith.constant 0.000000e+00 : f32
    %145 = arith.mulf %6, %cst_33 : f32
    %cst_34 = arith.constant 0.000000e+00 : f32
    %146 = arith.mulf %75, %cst_34 : f32
    %147 = arith.addf %145, %146 : f32
    %cst_35 = arith.constant 1.000000e+00 : f32
    %148 = arith.mulf %76, %cst_35 : f32
    %149 = arith.addf %147, %148 : f32
    %150 = arith.addf %149, %0 : f32
    %cst_36 = arith.constant 0.000000e+00 : f32
    %151 = arith.subf %cst_36, %2 : f32
    %152 = arith.mulf %151, %17 : f32
    %153 = arith.mulf %2, %12 : f32
    %154 = vector.broadcast %12 : f32 to vector<8x128xf32>
    %155 = arith.mulf %154, %87 : vector<8x128xf32>
    %156 = vector.broadcast %17 : f32 to vector<8x128xf32>
    %157 = arith.mulf %156, %92 : vector<8x128xf32>
    %158 = arith.addf %155, %157 : vector<8x128xf32>
    %159 = arith.mulf %62, %84 : vector<8x128xf32>
    %160 = arith.mulf %68, %158 : vector<8x128xf32>
    %161 = arith.addf %159, %160 : vector<8x128xf32>
    %162 = arith.mulf %62, %158 : vector<8x128xf32>
    %163 = arith.mulf %68, %84 : vector<8x128xf32>
    %164 = arith.subf %162, %163 : vector<8x128xf32>
    %165 = vector.broadcast %12 : f32 to vector<8x128xf32>
    %166 = arith.mulf %165, %92 : vector<8x128xf32>
    %167 = vector.broadcast %17 : f32 to vector<8x128xf32>
    %168 = arith.mulf %167, %87 : vector<8x128xf32>
    %169 = arith.subf %166, %168 : vector<8x128xf32>
    %170 = vector.broadcast %7 : f32 to vector<8x128xf32>
    %171 = arith.mulf %170, %84 : vector<8x128xf32>
    %172 = vector.broadcast %152 : f32 to vector<8x128xf32>
    %173 = arith.mulf %172, %87 : vector<8x128xf32>
    %174 = arith.addf %171, %173 : vector<8x128xf32>
    %175 = vector.broadcast %153 : f32 to vector<8x128xf32>
    %176 = arith.mulf %175, %92 : vector<8x128xf32>
    %177 = arith.addf %174, %176 : vector<8x128xf32>
    %178 = arith.addf %177, %102 : vector<8x128xf32>
    %179 = vector.broadcast %12 : f32 to vector<8x128xf32>
    %180 = arith.mulf %179, %113 : vector<8x128xf32>
    %181 = vector.broadcast %17 : f32 to vector<8x128xf32>
    %182 = arith.mulf %181, %118 : vector<8x128xf32>
    %183 = arith.addf %180, %182 : vector<8x128xf32>
    %184 = arith.mulf %62, %110 : vector<8x128xf32>
    %185 = arith.mulf %68, %183 : vector<8x128xf32>
    %186 = arith.addf %184, %185 : vector<8x128xf32>
    %187 = arith.mulf %62, %183 : vector<8x128xf32>
    %188 = arith.mulf %68, %110 : vector<8x128xf32>
    %189 = arith.subf %187, %188 : vector<8x128xf32>
    %190 = vector.broadcast %12 : f32 to vector<8x128xf32>
    %191 = arith.mulf %190, %118 : vector<8x128xf32>
    %192 = vector.broadcast %17 : f32 to vector<8x128xf32>
    %193 = arith.mulf %192, %113 : vector<8x128xf32>
    %194 = arith.subf %191, %193 : vector<8x128xf32>
    %195 = vector.broadcast %7 : f32 to vector<8x128xf32>
    %196 = arith.mulf %195, %110 : vector<8x128xf32>
    %197 = vector.broadcast %152 : f32 to vector<8x128xf32>
    %198 = arith.mulf %197, %113 : vector<8x128xf32>
    %199 = arith.addf %196, %198 : vector<8x128xf32>
    %200 = vector.broadcast %153 : f32 to vector<8x128xf32>
    %201 = arith.mulf %200, %118 : vector<8x128xf32>
    %202 = arith.addf %199, %201 : vector<8x128xf32>
    %203 = arith.addf %202, %128 : vector<8x128xf32>
    %204 = vector.broadcast %12 : f32 to vector<8x128xf32>
    %205 = arith.mulf %204, %141 : vector<8x128xf32>
    %206 = arith.mulf %17, %144 : f32
    %207 = vector.broadcast %206 : f32 to vector<8x128xf32>
    %208 = arith.addf %205, %207 : vector<8x128xf32>
    %209 = arith.mulf %62, %136 : vector<8x128xf32>
    %210 = arith.mulf %68, %208 : vector<8x128xf32>
    %211 = arith.addf %209, %210 : vector<8x128xf32>
    %212 = arith.mulf %62, %208 : vector<8x128xf32>
    %213 = arith.mulf %68, %136 : vector<8x128xf32>
    %214 = arith.subf %212, %213 : vector<8x128xf32>
    %215 = arith.mulf %12, %144 : f32
    %216 = vector.broadcast %17 : f32 to vector<8x128xf32>
    %217 = arith.mulf %216, %141 : vector<8x128xf32>
    %218 = vector.broadcast %215 : f32 to vector<8x128xf32>
    %219 = arith.subf %218, %217 : vector<8x128xf32>
    %220 = vector.broadcast %7 : f32 to vector<8x128xf32>
    %221 = arith.mulf %220, %136 : vector<8x128xf32>
    %222 = vector.broadcast %152 : f32 to vector<8x128xf32>
    %223 = arith.mulf %222, %141 : vector<8x128xf32>
    %224 = arith.addf %221, %223 : vector<8x128xf32>
    %225 = arith.mulf %153, %144 : f32
    %226 = vector.broadcast %225 : f32 to vector<8x128xf32>
    %227 = arith.addf %224, %226 : vector<8x128xf32>
    %228 = vector.broadcast %150 : f32 to vector<8x128xf32>
    %229 = arith.addf %227, %228 : vector<8x128xf32>
    %cst_37 = arith.constant 0.000000e+00 : f32
    %230 = arith.subf %cst_37, %3 : f32
    %231 = arith.mulf %230, %18 : f32
    %232 = arith.mulf %3, %13 : f32
    %233 = vector.broadcast %13 : f32 to vector<8x128xf32>
    %234 = arith.mulf %233, %164 : vector<8x128xf32>
    %235 = vector.broadcast %18 : f32 to vector<8x128xf32>
    %236 = arith.mulf %235, %169 : vector<8x128xf32>
    %237 = arith.addf %234, %236 : vector<8x128xf32>
    %238 = arith.mulf %63, %161 : vector<8x128xf32>
    %239 = arith.mulf %69, %237 : vector<8x128xf32>
    %240 = arith.addf %238, %239 : vector<8x128xf32>
    %241 = arith.mulf %63, %237 : vector<8x128xf32>
    %242 = arith.mulf %69, %161 : vector<8x128xf32>
    %243 = arith.subf %241, %242 : vector<8x128xf32>
    %244 = vector.broadcast %13 : f32 to vector<8x128xf32>
    %245 = arith.mulf %244, %169 : vector<8x128xf32>
    %246 = vector.broadcast %18 : f32 to vector<8x128xf32>
    %247 = arith.mulf %246, %164 : vector<8x128xf32>
    %248 = arith.subf %245, %247 : vector<8x128xf32>
    %249 = vector.broadcast %8 : f32 to vector<8x128xf32>
    %250 = arith.mulf %249, %161 : vector<8x128xf32>
    %251 = vector.broadcast %231 : f32 to vector<8x128xf32>
    %252 = arith.mulf %251, %164 : vector<8x128xf32>
    %253 = arith.addf %250, %252 : vector<8x128xf32>
    %254 = vector.broadcast %232 : f32 to vector<8x128xf32>
    %255 = arith.mulf %254, %169 : vector<8x128xf32>
    %256 = arith.addf %253, %255 : vector<8x128xf32>
    %257 = arith.addf %256, %178 : vector<8x128xf32>
    %258 = vector.broadcast %13 : f32 to vector<8x128xf32>
    %259 = arith.mulf %258, %189 : vector<8x128xf32>
    %260 = vector.broadcast %18 : f32 to vector<8x128xf32>
    %261 = arith.mulf %260, %194 : vector<8x128xf32>
    %262 = arith.addf %259, %261 : vector<8x128xf32>
    %263 = arith.mulf %63, %186 : vector<8x128xf32>
    %264 = arith.mulf %69, %262 : vector<8x128xf32>
    %265 = arith.addf %263, %264 : vector<8x128xf32>
    %266 = arith.mulf %63, %262 : vector<8x128xf32>
    %267 = arith.mulf %69, %186 : vector<8x128xf32>
    %268 = arith.subf %266, %267 : vector<8x128xf32>
    %269 = vector.broadcast %13 : f32 to vector<8x128xf32>
    %270 = arith.mulf %269, %194 : vector<8x128xf32>
    %271 = vector.broadcast %18 : f32 to vector<8x128xf32>
    %272 = arith.mulf %271, %189 : vector<8x128xf32>
    %273 = arith.subf %270, %272 : vector<8x128xf32>
    %274 = vector.broadcast %8 : f32 to vector<8x128xf32>
    %275 = arith.mulf %274, %186 : vector<8x128xf32>
    %276 = vector.broadcast %231 : f32 to vector<8x128xf32>
    %277 = arith.mulf %276, %189 : vector<8x128xf32>
    %278 = arith.addf %275, %277 : vector<8x128xf32>
    %279 = vector.broadcast %232 : f32 to vector<8x128xf32>
    %280 = arith.mulf %279, %194 : vector<8x128xf32>
    %281 = arith.addf %278, %280 : vector<8x128xf32>
    %282 = arith.addf %281, %203 : vector<8x128xf32>
    %283 = vector.broadcast %13 : f32 to vector<8x128xf32>
    %284 = arith.mulf %283, %214 : vector<8x128xf32>
    %285 = vector.broadcast %18 : f32 to vector<8x128xf32>
    %286 = arith.mulf %285, %219 : vector<8x128xf32>
    %287 = arith.addf %284, %286 : vector<8x128xf32>
    %288 = arith.mulf %63, %211 : vector<8x128xf32>
    %289 = arith.mulf %69, %287 : vector<8x128xf32>
    %290 = arith.addf %288, %289 : vector<8x128xf32>
    %291 = arith.mulf %63, %287 : vector<8x128xf32>
    %292 = arith.mulf %69, %211 : vector<8x128xf32>
    %293 = arith.subf %291, %292 : vector<8x128xf32>
    %294 = vector.broadcast %13 : f32 to vector<8x128xf32>
    %295 = arith.mulf %294, %219 : vector<8x128xf32>
    %296 = vector.broadcast %18 : f32 to vector<8x128xf32>
    %297 = arith.mulf %296, %214 : vector<8x128xf32>
    %298 = arith.subf %295, %297 : vector<8x128xf32>
    %299 = vector.broadcast %8 : f32 to vector<8x128xf32>
    %300 = arith.mulf %299, %211 : vector<8x128xf32>
    %301 = vector.broadcast %231 : f32 to vector<8x128xf32>
    %302 = arith.mulf %301, %214 : vector<8x128xf32>
    %303 = arith.addf %300, %302 : vector<8x128xf32>
    %304 = vector.broadcast %232 : f32 to vector<8x128xf32>
    %305 = arith.mulf %304, %219 : vector<8x128xf32>
    %306 = arith.addf %303, %305 : vector<8x128xf32>
    %307 = arith.addf %306, %229 : vector<8x128xf32>
    %cst_38 = arith.constant 0.000000e+00 : f32
    %308 = arith.subf %cst_38, %4 : f32
    %309 = arith.mulf %308, %19 : f32
    %310 = arith.mulf %4, %14 : f32
    %311 = vector.broadcast %14 : f32 to vector<8x128xf32>
    %312 = arith.mulf %311, %243 : vector<8x128xf32>
    %313 = vector.broadcast %19 : f32 to vector<8x128xf32>
    %314 = arith.mulf %313, %248 : vector<8x128xf32>
    %315 = arith.addf %312, %314 : vector<8x128xf32>
    %316 = arith.mulf %64, %240 : vector<8x128xf32>
    %317 = arith.mulf %70, %315 : vector<8x128xf32>
    %318 = arith.addf %316, %317 : vector<8x128xf32>
    %319 = arith.mulf %64, %315 : vector<8x128xf32>
    %320 = arith.mulf %70, %240 : vector<8x128xf32>
    %321 = arith.subf %319, %320 : vector<8x128xf32>
    %322 = vector.broadcast %14 : f32 to vector<8x128xf32>
    %323 = arith.mulf %322, %248 : vector<8x128xf32>
    %324 = vector.broadcast %19 : f32 to vector<8x128xf32>
    %325 = arith.mulf %324, %243 : vector<8x128xf32>
    %326 = arith.subf %323, %325 : vector<8x128xf32>
    %327 = vector.broadcast %9 : f32 to vector<8x128xf32>
    %328 = arith.mulf %327, %240 : vector<8x128xf32>
    %329 = vector.broadcast %309 : f32 to vector<8x128xf32>
    %330 = arith.mulf %329, %243 : vector<8x128xf32>
    %331 = arith.addf %328, %330 : vector<8x128xf32>
    %332 = vector.broadcast %310 : f32 to vector<8x128xf32>
    %333 = arith.mulf %332, %248 : vector<8x128xf32>
    %334 = arith.addf %331, %333 : vector<8x128xf32>
    %335 = arith.addf %334, %257 : vector<8x128xf32>
    %336 = vector.broadcast %14 : f32 to vector<8x128xf32>
    %337 = arith.mulf %336, %268 : vector<8x128xf32>
    %338 = vector.broadcast %19 : f32 to vector<8x128xf32>
    %339 = arith.mulf %338, %273 : vector<8x128xf32>
    %340 = arith.addf %337, %339 : vector<8x128xf32>
    %341 = arith.mulf %64, %265 : vector<8x128xf32>
    %342 = arith.mulf %70, %340 : vector<8x128xf32>
    %343 = arith.addf %341, %342 : vector<8x128xf32>
    %344 = arith.mulf %64, %340 : vector<8x128xf32>
    %345 = arith.mulf %70, %265 : vector<8x128xf32>
    %346 = arith.subf %344, %345 : vector<8x128xf32>
    %347 = vector.broadcast %14 : f32 to vector<8x128xf32>
    %348 = arith.mulf %347, %273 : vector<8x128xf32>
    %349 = vector.broadcast %19 : f32 to vector<8x128xf32>
    %350 = arith.mulf %349, %268 : vector<8x128xf32>
    %351 = arith.subf %348, %350 : vector<8x128xf32>
    %352 = vector.broadcast %9 : f32 to vector<8x128xf32>
    %353 = arith.mulf %352, %265 : vector<8x128xf32>
    %354 = vector.broadcast %309 : f32 to vector<8x128xf32>
    %355 = arith.mulf %354, %268 : vector<8x128xf32>
    %356 = arith.addf %353, %355 : vector<8x128xf32>
    %357 = vector.broadcast %310 : f32 to vector<8x128xf32>
    %358 = arith.mulf %357, %273 : vector<8x128xf32>
    %359 = arith.addf %356, %358 : vector<8x128xf32>
    %360 = arith.addf %359, %282 : vector<8x128xf32>
    %361 = vector.broadcast %14 : f32 to vector<8x128xf32>
    %362 = arith.mulf %361, %293 : vector<8x128xf32>
    %363 = vector.broadcast %19 : f32 to vector<8x128xf32>
    %364 = arith.mulf %363, %298 : vector<8x128xf32>
    %365 = arith.addf %362, %364 : vector<8x128xf32>
    %366 = arith.mulf %64, %290 : vector<8x128xf32>
    %367 = arith.mulf %70, %365 : vector<8x128xf32>
    %368 = arith.addf %366, %367 : vector<8x128xf32>
    %369 = arith.mulf %64, %365 : vector<8x128xf32>
    %370 = arith.mulf %70, %290 : vector<8x128xf32>
    %371 = arith.subf %369, %370 : vector<8x128xf32>
    %372 = vector.broadcast %14 : f32 to vector<8x128xf32>
    %373 = arith.mulf %372, %298 : vector<8x128xf32>
    %374 = vector.broadcast %19 : f32 to vector<8x128xf32>
    %375 = arith.mulf %374, %293 : vector<8x128xf32>
    %376 = arith.subf %373, %375 : vector<8x128xf32>
    %377 = vector.broadcast %9 : f32 to vector<8x128xf32>
    %378 = arith.mulf %377, %290 : vector<8x128xf32>
    %379 = vector.broadcast %309 : f32 to vector<8x128xf32>
    %380 = arith.mulf %379, %293 : vector<8x128xf32>
    %381 = arith.addf %378, %380 : vector<8x128xf32>
    %382 = vector.broadcast %310 : f32 to vector<8x128xf32>
    %383 = arith.mulf %382, %298 : vector<8x128xf32>
    %384 = arith.addf %381, %383 : vector<8x128xf32>
    %385 = arith.addf %384, %307 : vector<8x128xf32>
    %cst_39 = arith.constant 0.000000e+00 : f32
    %386 = arith.subf %cst_39, %5 : f32
    %387 = arith.mulf %386, %20 : f32
    %388 = arith.mulf %5, %15 : f32
    %389 = vector.broadcast %15 : f32 to vector<8x128xf32>
    %390 = arith.mulf %389, %321 : vector<8x128xf32>
    %391 = vector.broadcast %20 : f32 to vector<8x128xf32>
    %392 = arith.mulf %391, %326 : vector<8x128xf32>
    %393 = arith.addf %390, %392 : vector<8x128xf32>
    %394 = arith.mulf %65, %318 : vector<8x128xf32>
    %395 = arith.mulf %71, %393 : vector<8x128xf32>
    %396 = arith.addf %394, %395 : vector<8x128xf32>
    %397 = arith.mulf %65, %393 : vector<8x128xf32>
    %398 = arith.mulf %71, %318 : vector<8x128xf32>
    %399 = arith.subf %397, %398 : vector<8x128xf32>
    %400 = vector.broadcast %15 : f32 to vector<8x128xf32>
    %401 = arith.mulf %400, %326 : vector<8x128xf32>
    %402 = vector.broadcast %20 : f32 to vector<8x128xf32>
    %403 = arith.mulf %402, %321 : vector<8x128xf32>
    %404 = arith.subf %401, %403 : vector<8x128xf32>
    %405 = vector.broadcast %10 : f32 to vector<8x128xf32>
    %406 = arith.mulf %405, %318 : vector<8x128xf32>
    %407 = vector.broadcast %387 : f32 to vector<8x128xf32>
    %408 = arith.mulf %407, %321 : vector<8x128xf32>
    %409 = arith.addf %406, %408 : vector<8x128xf32>
    %410 = vector.broadcast %388 : f32 to vector<8x128xf32>
    %411 = arith.mulf %410, %326 : vector<8x128xf32>
    %412 = arith.addf %409, %411 : vector<8x128xf32>
    %413 = arith.addf %412, %335 : vector<8x128xf32>
    %414 = vector.broadcast %15 : f32 to vector<8x128xf32>
    %415 = arith.mulf %414, %346 : vector<8x128xf32>
    %416 = vector.broadcast %20 : f32 to vector<8x128xf32>
    %417 = arith.mulf %416, %351 : vector<8x128xf32>
    %418 = arith.addf %415, %417 : vector<8x128xf32>
    %419 = arith.mulf %65, %343 : vector<8x128xf32>
    %420 = arith.mulf %71, %418 : vector<8x128xf32>
    %421 = arith.addf %419, %420 : vector<8x128xf32>
    %422 = arith.mulf %65, %418 : vector<8x128xf32>
    %423 = arith.mulf %71, %343 : vector<8x128xf32>
    %424 = arith.subf %422, %423 : vector<8x128xf32>
    %425 = vector.broadcast %15 : f32 to vector<8x128xf32>
    %426 = arith.mulf %425, %351 : vector<8x128xf32>
    %427 = vector.broadcast %20 : f32 to vector<8x128xf32>
    %428 = arith.mulf %427, %346 : vector<8x128xf32>
    %429 = arith.subf %426, %428 : vector<8x128xf32>
    %430 = vector.broadcast %10 : f32 to vector<8x128xf32>
    %431 = arith.mulf %430, %343 : vector<8x128xf32>
    %432 = vector.broadcast %387 : f32 to vector<8x128xf32>
    %433 = arith.mulf %432, %346 : vector<8x128xf32>
    %434 = arith.addf %431, %433 : vector<8x128xf32>
    %435 = vector.broadcast %388 : f32 to vector<8x128xf32>
    %436 = arith.mulf %435, %351 : vector<8x128xf32>
    %437 = arith.addf %434, %436 : vector<8x128xf32>
    %438 = arith.addf %437, %360 : vector<8x128xf32>
    %439 = vector.broadcast %15 : f32 to vector<8x128xf32>
    %440 = arith.mulf %439, %371 : vector<8x128xf32>
    %441 = vector.broadcast %20 : f32 to vector<8x128xf32>
    %442 = arith.mulf %441, %376 : vector<8x128xf32>
    %443 = arith.addf %440, %442 : vector<8x128xf32>
    %444 = arith.mulf %65, %368 : vector<8x128xf32>
    %445 = arith.mulf %71, %443 : vector<8x128xf32>
    %446 = arith.addf %444, %445 : vector<8x128xf32>
    %447 = arith.mulf %65, %443 : vector<8x128xf32>
    %448 = arith.mulf %71, %368 : vector<8x128xf32>
    %449 = arith.subf %447, %448 : vector<8x128xf32>
    %450 = vector.broadcast %15 : f32 to vector<8x128xf32>
    %451 = arith.mulf %450, %376 : vector<8x128xf32>
    %452 = vector.broadcast %20 : f32 to vector<8x128xf32>
    %453 = arith.mulf %452, %371 : vector<8x128xf32>
    %454 = arith.subf %451, %453 : vector<8x128xf32>
    %455 = vector.broadcast %10 : f32 to vector<8x128xf32>
    %456 = arith.mulf %455, %368 : vector<8x128xf32>
    %457 = vector.broadcast %387 : f32 to vector<8x128xf32>
    %458 = arith.mulf %457, %371 : vector<8x128xf32>
    %459 = arith.addf %456, %458 : vector<8x128xf32>
    %460 = vector.broadcast %388 : f32 to vector<8x128xf32>
    %461 = arith.mulf %460, %376 : vector<8x128xf32>
    %462 = arith.addf %459, %461 : vector<8x128xf32>
    %463 = arith.addf %462, %385 : vector<8x128xf32>
    %464 = vector.broadcast %27 : f32 to vector<8x128xf32>
    %465 = arith.mulf %396, %464 : vector<8x128xf32>
    %466 = vector.broadcast %30 : f32 to vector<8x128xf32>
    %467 = arith.mulf %399, %466 : vector<8x128xf32>
    %468 = arith.addf %465, %467 : vector<8x128xf32>
    %469 = vector.broadcast %33 : f32 to vector<8x128xf32>
    %470 = arith.mulf %404, %469 : vector<8x128xf32>
    %471 = arith.addf %468, %470 : vector<8x128xf32>
    %472 = vector.broadcast %28 : f32 to vector<8x128xf32>
    %473 = arith.mulf %396, %472 : vector<8x128xf32>
    %474 = vector.broadcast %31 : f32 to vector<8x128xf32>
    %475 = arith.mulf %399, %474 : vector<8x128xf32>
    %476 = arith.addf %473, %475 : vector<8x128xf32>
    %477 = vector.broadcast %34 : f32 to vector<8x128xf32>
    %478 = arith.mulf %404, %477 : vector<8x128xf32>
    %479 = arith.addf %476, %478 : vector<8x128xf32>
    %480 = vector.broadcast %29 : f32 to vector<8x128xf32>
    %481 = arith.mulf %396, %480 : vector<8x128xf32>
    %482 = vector.broadcast %32 : f32 to vector<8x128xf32>
    %483 = arith.mulf %399, %482 : vector<8x128xf32>
    %484 = arith.addf %481, %483 : vector<8x128xf32>
    %485 = vector.broadcast %35 : f32 to vector<8x128xf32>
    %486 = arith.mulf %404, %485 : vector<8x128xf32>
    %487 = arith.addf %484, %486 : vector<8x128xf32>
    %488 = vector.broadcast %27 : f32 to vector<8x128xf32>
    %489 = arith.mulf %421, %488 : vector<8x128xf32>
    %490 = vector.broadcast %30 : f32 to vector<8x128xf32>
    %491 = arith.mulf %424, %490 : vector<8x128xf32>
    %492 = arith.addf %489, %491 : vector<8x128xf32>
    %493 = vector.broadcast %33 : f32 to vector<8x128xf32>
    %494 = arith.mulf %429, %493 : vector<8x128xf32>
    %495 = arith.addf %492, %494 : vector<8x128xf32>
    %496 = vector.broadcast %28 : f32 to vector<8x128xf32>
    %497 = arith.mulf %421, %496 : vector<8x128xf32>
    %498 = vector.broadcast %31 : f32 to vector<8x128xf32>
    %499 = arith.mulf %424, %498 : vector<8x128xf32>
    %500 = arith.addf %497, %499 : vector<8x128xf32>
    %501 = vector.broadcast %34 : f32 to vector<8x128xf32>
    %502 = arith.mulf %429, %501 : vector<8x128xf32>
    %503 = arith.addf %500, %502 : vector<8x128xf32>
    %504 = vector.broadcast %29 : f32 to vector<8x128xf32>
    %505 = arith.mulf %421, %504 : vector<8x128xf32>
    %506 = vector.broadcast %32 : f32 to vector<8x128xf32>
    %507 = arith.mulf %424, %506 : vector<8x128xf32>
    %508 = arith.addf %505, %507 : vector<8x128xf32>
    %509 = vector.broadcast %35 : f32 to vector<8x128xf32>
    %510 = arith.mulf %429, %509 : vector<8x128xf32>
    %511 = arith.addf %508, %510 : vector<8x128xf32>
    %512 = vector.broadcast %27 : f32 to vector<8x128xf32>
    %513 = arith.mulf %446, %512 : vector<8x128xf32>
    %514 = vector.broadcast %30 : f32 to vector<8x128xf32>
    %515 = arith.mulf %449, %514 : vector<8x128xf32>
    %516 = arith.addf %513, %515 : vector<8x128xf32>
    %517 = vector.broadcast %33 : f32 to vector<8x128xf32>
    %518 = arith.mulf %454, %517 : vector<8x128xf32>
    %519 = arith.addf %516, %518 : vector<8x128xf32>
    %520 = vector.broadcast %28 : f32 to vector<8x128xf32>
    %521 = arith.mulf %446, %520 : vector<8x128xf32>
    %522 = vector.broadcast %31 : f32 to vector<8x128xf32>
    %523 = arith.mulf %449, %522 : vector<8x128xf32>
    %524 = arith.addf %521, %523 : vector<8x128xf32>
    %525 = vector.broadcast %34 : f32 to vector<8x128xf32>
    %526 = arith.mulf %454, %525 : vector<8x128xf32>
    %527 = arith.addf %524, %526 : vector<8x128xf32>
    %528 = vector.broadcast %29 : f32 to vector<8x128xf32>
    %529 = arith.mulf %446, %528 : vector<8x128xf32>
    %530 = vector.broadcast %32 : f32 to vector<8x128xf32>
    %531 = arith.mulf %449, %530 : vector<8x128xf32>
    %532 = arith.addf %529, %531 : vector<8x128xf32>
    %533 = vector.broadcast %35 : f32 to vector<8x128xf32>
    %534 = arith.mulf %454, %533 : vector<8x128xf32>
    %535 = arith.addf %532, %534 : vector<8x128xf32>
    %c0_40 = arith.constant 0 : index
    %c0_41 = arith.constant 0 : index
    %c0_42 = arith.constant 0 : index
    %536 = vector.load %arg3[%c0_40, %c0_41, %c0_42] : memref<12x8x128xf32, #tpu.memory_space<vmem>>, vector<1x8x128xf32>
    %537 = vector.shape_cast %536 : vector<1x8x128xf32> to vector<8x128xf32>
    %538 = vector.shape_cast %413 : vector<8x128xf32> to vector<1x8x128xf32>
    tpu.vector_store %arg3[%c0_40, %c0_41, %c0_42], %538 {strides = array<i32>} : memref<12x8x128xf32, #tpu.memory_space<vmem>>, vector<1x8x128xf32>,
    %c1_43 = arith.constant 1 : index
    %c0_44 = arith.constant 0 : index
    %c0_45 = arith.constant 0 : index
    %539 = vector.load %arg3[%c1_43, %c0_44, %c0_45] : memref<12x8x128xf32, #tpu.memory_space<vmem>>, vector<1x8x128xf32>
    %540 = vector.shape_cast %539 : vector<1x8x128xf32> to vector<8x128xf32>
    %541 = vector.shape_cast %438 : vector<8x128xf32> to vector<1x8x128xf32>
    tpu.vector_store %arg3[%c1_43, %c0_44, %c0_45], %541 {strides = array<i32>} : memref<12x8x128xf32, #tpu.memory_space<vmem>>, vector<1x8x128xf32>,
    %c2_46 = arith.constant 2 : index
    %c0_47 = arith.constant 0 : index
    %c0_48 = arith.constant 0 : index
    %542 = vector.load %arg3[%c2_46, %c0_47, %c0_48] : memref<12x8x128xf32, #tpu.memory_space<vmem>>, vector<1x8x128xf32>
    %543 = vector.shape_cast %542 : vector<1x8x128xf32> to vector<8x128xf32>
    %544 = vector.shape_cast %463 : vector<8x128xf32> to vector<1x8x128xf32>
    tpu.vector_store %arg3[%c2_46, %c0_47, %c0_48], %544 {strides = array<i32>} : memref<12x8x128xf32, #tpu.memory_space<vmem>>, vector<1x8x128xf32>,
    %c3_49 = arith.constant 3 : index
    %c0_50 = arith.constant 0 : index
    %c0_51 = arith.constant 0 : index
    %545 = vector.load %arg3[%c3_49, %c0_50, %c0_51] : memref<12x8x128xf32, #tpu.memory_space<vmem>>, vector<1x8x128xf32>
    %546 = vector.shape_cast %545 : vector<1x8x128xf32> to vector<8x128xf32>
    %547 = vector.shape_cast %471 : vector<8x128xf32> to vector<1x8x128xf32>
    tpu.vector_store %arg3[%c3_49, %c0_50, %c0_51], %547 {strides = array<i32>} : memref<12x8x128xf32, #tpu.memory_space<vmem>>, vector<1x8x128xf32>,
    %c4_52 = arith.constant 4 : index
    %c0_53 = arith.constant 0 : index
    %c0_54 = arith.constant 0 : index
    %548 = vector.load %arg3[%c4_52, %c0_53, %c0_54] : memref<12x8x128xf32, #tpu.memory_space<vmem>>, vector<1x8x128xf32>
    %549 = vector.shape_cast %548 : vector<1x8x128xf32> to vector<8x128xf32>
    %550 = vector.shape_cast %479 : vector<8x128xf32> to vector<1x8x128xf32>
    tpu.vector_store %arg3[%c4_52, %c0_53, %c0_54], %550 {strides = array<i32>} : memref<12x8x128xf32, #tpu.memory_space<vmem>>, vector<1x8x128xf32>,
    %c5_55 = arith.constant 5 : index
    %c0_56 = arith.constant 0 : index
    %c0_57 = arith.constant 0 : index
    %551 = vector.load %arg3[%c5_55, %c0_56, %c0_57] : memref<12x8x128xf32, #tpu.memory_space<vmem>>, vector<1x8x128xf32>
    %552 = vector.shape_cast %551 : vector<1x8x128xf32> to vector<8x128xf32>
    %553 = vector.shape_cast %487 : vector<8x128xf32> to vector<1x8x128xf32>
    tpu.vector_store %arg3[%c5_55, %c0_56, %c0_57], %553 {strides = array<i32>} : memref<12x8x128xf32, #tpu.memory_space<vmem>>, vector<1x8x128xf32>,
    %c6_58 = arith.constant 6 : index
    %c0_59 = arith.constant 0 : index
    %c0_60 = arith.constant 0 : index
    %554 = vector.load %arg3[%c6_58, %c0_59, %c0_60] : memref<12x8x128xf32, #tpu.memory_space<vmem>>, vector<1x8x128xf32>
    %555 = vector.shape_cast %554 : vector<1x8x128xf32> to vector<8x128xf32>
    %556 = vector.shape_cast %495 : vector<8x128xf32> to vector<1x8x128xf32>
    tpu.vector_store %arg3[%c6_58, %c0_59, %c0_60], %556 {strides = array<i32>} : memref<12x8x128xf32, #tpu.memory_space<vmem>>, vector<1x8x128xf32>,
    %c7_61 = arith.constant 7 : index
    %c0_62 = arith.constant 0 : index
    %c0_63 = arith.constant 0 : index
    %557 = vector.load %arg3[%c7_61, %c0_62, %c0_63] : memref<12x8x128xf32, #tpu.memory_space<vmem>>, vector<1x8x128xf32>
    %558 = vector.shape_cast %557 : vector<1x8x128xf32> to vector<8x128xf32>
    %559 = vector.shape_cast %503 : vector<8x128xf32> to vector<1x8x128xf32>
    tpu.vector_store %arg3[%c7_61, %c0_62, %c0_63], %559 {strides = array<i32>} : memref<12x8x128xf32, #tpu.memory_space<vmem>>, vector<1x8x128xf32>,
    %c8_64 = arith.constant 8 : index
    %c0_65 = arith.constant 0 : index
    %c0_66 = arith.constant 0 : index
    %560 = vector.load %arg3[%c8_64, %c0_65, %c0_66] : memref<12x8x128xf32, #tpu.memory_space<vmem>>, vector<1x8x128xf32>
    %561 = vector.shape_cast %560 : vector<1x8x128xf32> to vector<8x128xf32>
    %562 = vector.shape_cast %511 : vector<8x128xf32> to vector<1x8x128xf32>
    tpu.vector_store %arg3[%c8_64, %c0_65, %c0_66], %562 {strides = array<i32>} : memref<12x8x128xf32, #tpu.memory_space<vmem>>, vector<1x8x128xf32>,
    %c9_67 = arith.constant 9 : index
    %c0_68 = arith.constant 0 : index
    %c0_69 = arith.constant 0 : index
    %563 = vector.load %arg3[%c9_67, %c0_68, %c0_69] : memref<12x8x128xf32, #tpu.memory_space<vmem>>, vector<1x8x128xf32>
    %564 = vector.shape_cast %563 : vector<1x8x128xf32> to vector<8x128xf32>
    %565 = vector.shape_cast %519 : vector<8x128xf32> to vector<1x8x128xf32>
    tpu.vector_store %arg3[%c9_67, %c0_68, %c0_69], %565 {strides = array<i32>} : memref<12x8x128xf32, #tpu.memory_space<vmem>>, vector<1x8x128xf32>,
    %c10_70 = arith.constant 10 : index
    %c0_71 = arith.constant 0 : index
    %c0_72 = arith.constant 0 : index
    %566 = vector.load %arg3[%c10_70, %c0_71, %c0_72] : memref<12x8x128xf32, #tpu.memory_space<vmem>>, vector<1x8x128xf32>
    %567 = vector.shape_cast %566 : vector<1x8x128xf32> to vector<8x128xf32>
    %568 = vector.shape_cast %527 : vector<8x128xf32> to vector<1x8x128xf32>
    tpu.vector_store %arg3[%c10_70, %c0_71, %c0_72], %568 {strides = array<i32>} : memref<12x8x128xf32, #tpu.memory_space<vmem>>, vector<1x8x128xf32>,
    %c11 = arith.constant 11 : index
    %c0_73 = arith.constant 0 : index
    %c0_74 = arith.constant 0 : index
    %569 = vector.load %arg3[%c11, %c0_73, %c0_74] : memref<12x8x128xf32, #tpu.memory_space<vmem>>, vector<1x8x128xf32>
    %570 = vector.shape_cast %569 : vector<1x8x128xf32> to vector<8x128xf32>
    %571 = vector.shape_cast %535 : vector<8x128xf32> to vector<1x8x128xf32>
    tpu.vector_store %arg3[%c11, %c0_73, %c0_74], %571 {strides = array<i32>} : memref<12x8x128xf32, #tpu.memory_space<vmem>>, vector<1x8x128xf32>,
    return
  }
  func.func @transform_0(%arg0: i32) -> i32 {
    %c0_i32 = arith.constant 0 : i32
    %c0_i32_0 = arith.constant 0 : i32
    return %c0_i32 : i32
  }
  func.func @transform_1(%arg0: i32) -> (i32, i32, i32) {
    %c0_i32 = arith.constant 0 : i32
    %c0_i32_0 = arith.constant 0 : i32
    %c0_i32_1 = arith.constant 0 : i32
    return %c0_i32, %arg0, %c0_i32_0 : i32, i32, i32
  }
  func.func @transform_2(%arg0: i32) -> (i32, i32, i32) {
    %c0_i32 = arith.constant 0 : i32
    %c0_i32_0 = arith.constant 0 : i32
    %c0_i32_1 = arith.constant 0 : i32
    return %c0_i32, %arg0, %c0_i32_0 : i32, i32, i32
  }
}

</mosaic_0001>

<bundles_post_ra>
// kernel: tpu_custom_call.1
= control target key start
LH: loop header
LB: loop body
LE: loop exit
PB: predicated region body
PF: predicated region fallthrough
CT: control target
= control target key end

     0   :  { %7 = vsyncpa [#allocation5], 0  ;;  %s3817_s0 = inlined_call_operand.hbm [shape: f32[39], index: 0, kind: input, shape index: {}]   ;;  %s3818_s1 = inlined_call_operand.hbm [shape: f32[6,8,128], index: 1, kind: input, shape index: {}]   ;;  %s3819_s2 = inlined_call_operand.hbm [shape: f32[12,8,128], index: 2, kind: output, shape index: {}]  }
   0x1   :  { %8 = vsyncpa [#allocation3], 0 }
   0x2   :  { %9 = vsyncpa [#allocation4], 0  ;;  %s15_s11 = sshll.u32 %s3817_s0, 4  ;;  %s23_s14 = sshll.u32 %s3818_s1, 4  ;;  %s16_s11 = int_to_ptr.hbm [resolvable:$true] %s15_s11  ;;  %s24_s14 = int_to_ptr.hbm [resolvable:$true] %s23_s14 }
   0x3   :  { %s2510_s15 = smov [#allocation2]   ;;  %s2511_s16 = smov [#allocation6]  }
   0x4   :  { %18 = dma.hbm_to_smem %s16_s11, 16, %s2510_s15, [#allocation5]  }
   0x5   :  { %s25_s17 = sshll.u32 %s2511_s16, 4  ;;  %s2512_s18 = smov 128   ;;  %s26_s17 = int_to_ptr.vmem [resolvable:$true] %s25_s17 }
   0x6   :  { %s2513_s19 = smov 8  }
   0x7   :  { %31 = dma.hbm_to_vmem [thread:$0]  %s24_s14, 768, %s26_s17, [#allocation3], %s2512_s18, %s2512_s18, %s2513_s19  }
   0x8   :  { %2504 = dma.done.wait [#allocation5], 16  }
   0x9   :  { %2505 = vsyncadd [#allocation5], 4294967280 }
   0xa   :  { %2506 = dma.done.wait [#allocation3], 768  }
   0xb   :  { %2507 = vsyncadd [#allocation3], 4294966528 }
   0xc   :  { %40 = sfence }
   0xd   :  { %s2381_s0 = sld [smem:[#allocation2 + $0x18]]  ;;  %v77_v0 = vld [vmem:[#allocation6] sm:$0xff]  ;;  %v81_v1 = vld [vmem:[#allocation6 + $0x8] sm:$0xff]  ;;  %v85_v7 = vld [vmem:[#allocation6 + $0x10] sm:$0xff]  ;;  %v2514_v30 = vmov 683565275  }
   0xe   :  { %s2382_s20 = sld [smem:[#allocation2 + $0x19]]  ;;  %v2515_v32 = vmov 2475754826   ;;  %v2516_v34 = vmov 2131351028  }
   0xf   :  { %s2383_s1 = sld [smem:[#allocation2 + $0x1a]]  ;;  %v2517_v36 = vmov 2102212464   ;;  %v2518_v38 = vmov 920167782  }
  0x10   :  { %v2519_v47 = vmov 1326507024   ;;  %s2744_s21 = sld [smem:[#allocation2 + $0x1b]] }
  0x11   :  { %s2782_s22 = sld [smem:[#allocation2 + $0x1c]] }
  0x12   :  { %s2790_s23 = sld [smem:[#allocation2 + $0x1d]] }
  0x13   :  { %v78_v2 = vstv %s2381_s0  ;;  %s3238_s24 = sld [smem:[#allocation2 + $0xc]] }
  0x14   :  { %v2546_v3 = vsub.f32 %v77_v0, %v78_v2  ;;  %v82_v4 = vstv %s2382_s20  ;;  %s3240_s25 = sld [smem:[#allocation2 + $0x12]] }
  0x15   :  { %v2548_v5 = vsub.f32 %v81_v1, %v82_v4  ;;  %v86_v8 = vstv %s2383_s1  ;;  %s3338_s27 = sld [smem:[#allocation2 + $0x1]] }
  0x16   :  { %v100_v6 = vand.u32 2147483647, %v2546_v3  ;;  %v103_v9 = vand.u32 2139095040, %v2546_v3  ;;  %v2555_v13 = vsub.f32 %v85_v7, %v86_v8  ;;  %s3372_s29 = sld [smem:[#allocation2 + $0x2]] }
  0x17   :  { %v257_v12 = vand.u32 2139095040, %v2548_v5  ;;  %v254_v14 = vand.u32 2147483647, %v2548_v5  ;;  %s3378_s30 = sld [smem:[#allocation2 + $0x6]] }
  0x18   :  { %v107_v10 = vand.u32 8388607, %v100_v6  ;;  %v104_v11 = vshrl.u32 %v103_v9, 23  ;;  %v411_v21 = vand.u32 2139095040, %v2555_v13  ;;  %s3396_s5 = sld [smem:[#allocation2 + $0xd]] }
  0x19   :  { %v258_v16 = vshrl.u32 %v257_v12, 23  ;;  %v261_v20 = vand.u32 8388607, %v254_v14  ;;  %s1969_s28 = smul.f32 0.0, %s3238_s24  ;;  %s3410_s7 = sld [smem:[#allocation2 + $0x13]] }
  0x1a   :  { %v2396_v15 = vadd.s32 4294967169, %v104_v11  ;;  %v108_v17 = vor.u32 8388608, %v107_v10  ;;  %v2563_v28 = vshrl.u32 %v411_v21, 23  ;;  %s1960_s26 = smul.f32 0.0, %s3240_s25  ;;  %s3436_s11 = sld [smem:[#allocation2 + $0x7]] }
  0x1b   :  { %v2399_v19 = vadd.s32 4294967169, %v258_v16  ;;  %v262_v27 = vor.u32 8388608, %v261_v20  ;;  %s3388_s3 = smul.f32 %s3238_s24, %s3338_s27  ;;  %s1955_s4 = ssub.f32 0.0, %s3338_s27 }
  0x1c   :  { %v110_v18 = vadd.s32 1, %v2396_v15  ;;  %v2561_v24 = vshll.u32 %v108_v17, 8  ;;  %s1998_s9 = sadd.f32 %s3240_s25, %s1969_s28 }
  0x1d   :  { %v264_v22 = vadd.s32 1, %v2399_v19  ;;  %v2584_v2 = vshll.u32 %v262_v27, 8  ;;  %s1979_s6 = smul.f32 0.0, %s3388_s3  ;;  %s2012_s10 = ssub.f32 0.0, %s3372_s29 }
  0x1e   :  { %vm111_vm0 = vcmp.gt.s32.totalorder %v110_v18, 0  ;;  %v149_v40 = vand.u32 65535, %v2561_v24  ;;  %v150_v1 = vshrl.u32 %v2561_v24, 16  ;;  %s3417_s8 = smul.f32 %s3240_s25, %s1955_s4  ;;  %s3481_s16 = sld [smem:[#allocation2]] }
  0x1f   :  { %v112_v23 = vsel %vm111_vm0, %v110_v18, 0  ;;  %vm265_vm1 = vcmp.gt.s32.totalorder %v264_v22, 0  ;;  %s2013_s12 = smul.f32 %s3410_s7, %s2012_s10  ;;  %s3494_s17 = ssub.f32 %s3238_s24, %s1960_s26 }
  0x20   :  { %v114_v25 = vand.u32 31, %v112_v23  ;;  %v113_v26 = vshrl.u32 %v112_v23, 5  ;;  %v266_v41 = vsel %vm265_vm1, %v264_v22, 0  ;;  %s3456_s13 = smul.f32 %s3396_s5, %s3372_s29  ;;  %s3517_s20 = sld [smem:[#allocation2 + $0x3]] }
  0x21   :  { %v2578_v54 = vand.u32 31, %v266_v41  ;;  %v2591_v9 = vshrl.u32 %v266_v41, 5  ;;  %s2007_s14 = smul.f32 0.0, %s3378_s30  ;;  %s3567_s27 = sld [smem:[#allocation2 + $0x8]] }
  0x22   :  { %v115_v29 = vsub.s32 32, %v114_v25  ;;  %v117_v31 = vshll.u32 %v2514_v30, %v114_v25  ;;  %v120_v33 = vshll.u32 %v2515_v32, %v114_v25  ;;  %v123_v35 = vshll.u32 %v2516_v34, %v114_v25  ;;  %s2008_s15 = smul.f32 0.0, %s3417_s8  ;;  %s3646_s4 = sld [smem:[#allocation2 + $0xf]] }
  0x23   :  { %v126_v37 = vshll.u32 %v2517_v36, %v114_v25  ;;  %v129_v39 = vshll.u32 %v2518_v38, %v114_v25  ;;  %vm132_vm2 = vcmp.lt.s32.totalorder %v113_v26, 1  ;;  %vm133_vm3 = vcmp.lt.s32.totalorder %v113_v26, 2  ;;  %s3701_s10 = sld [smem:[#allocation2 + $0x5]] }
  0x24   :  { %v116_v42 = vshrl.u32 %v2514_v30, %v115_v29  ;;  %v118_v43 = vshrl.u32 %v2515_v32, %v115_v29  ;;  %v121_v44 = vshrl.u32 %v2516_v34, %v115_v29  ;;  %v124_v45 = vshrl.u32 %v2517_v36, %v115_v29  ;;  %s3507_s0 = sadd.f32 %s2008_s15, %s2007_s14 }
  0x25   :  { %v127_v46 = vshrl.u32 %v2518_v38, %v115_v29  ;;  %v130_v48 = vshrl.u32 %v2519_v47, %v115_v29  ;;  %vm135_vm4 = vcmp.lt.s32.totalorder %v113_v26, 4  ;;  %vm134_vm5 = vcmp.lt.s32.totalorder %v113_v26, 3 }
  0x26   :  { %v119_v49 = vor.u32 %v118_v43, %v117_v31  ;;  %v122_v50 = vor.u32 %v121_v44, %v120_v33  ;;  %v125_v51 = vor.u32 %v124_v45, %v123_v35  ;;  %v2581_v62 = vsub.s32 32, %v2578_v54  ;;  %s2010_s1 = sadd.f32 %s3507_s0, %s3388_s3 }
  0x27   :  { %v128_v52 = vor.u32 %v127_v46, %v126_v37  ;;  %v131_v53 = vor.u32 %v130_v48, %v129_v39  ;;  %v271_v16 = vshll.u32 %v2514_v30, %v2578_v54  ;;  %v274_v18 = vshll.u32 %v2515_v32, %v2578_v54  ;;  %s3753_s0 = sld [smem:[#allocation2 + $0x1f]] }
  0x28   :  { %v136_v55 = vsel %vm132_vm2, %v116_v42, %v119_v49  ;;  %v137_v56 = vsel %vm135_vm4, %v125_v51, 2102212464  ;;  %v140_v57 = vsel %vm132_vm2, %v119_v49, %v122_v50  ;;  %v144_v58 = vsel %vm132_vm2, %v122_v50, %v125_v51 }
  0x29   :  { %v138_v59 = vsel %vm134_vm5, %v122_v50, %v137_v56  ;;  %v141_v60 = vsel %vm135_vm4, %v128_v52, 920167782  ;;  %v145_v61 = vsel %vm135_vm4, %v131_v53, 1326507024  ;;  %v272_v17 = vshrl.u32 %v2515_v32, %v2581_v62  ;;  %s2202_s14 = ssub.f32 0.0, %s3701_s10 }
  0x2a   :  { %v142_v63 = vsel %vm134_vm5, %v125_v51, %v141_v60  ;;  %v146_v0 = vsel %vm134_vm5, %v128_v52, %v145_v61  ;;  %v2587_v4 = vsel %vm133_vm3, %v136_v55, %v138_v59  ;;  %v275_v19 = vshrl.u32 %v2516_v34, %v2581_v62 }
  0x2b   :  { %v143_v7 = vsel %vm133_vm3, %v140_v57, %v142_v63  ;;  %v147_v8 = vsel %vm133_vm3, %v144_v58, %v146_v0  ;;  %v277_v23 = vshll.u32 %v2516_v34, %v2578_v54  ;;  %v2603_v46 = vor.u32 %v272_v17, %v271_v16 }
  0x2c   :  { %v151_v10 = vand.u32 65535, %v147_v8  ;;  %v152_v11 = vshrl.u32 %v147_v8, 16  ;;  %v173_v12 = vand.u32 65535, %v143_v7  ;;  %v174_v15 = vshrl.u32 %v143_v7, 16 }
  0x2d   :  { %v2520_v48 = vmov 0   ;;  %v280_v53 = vshll.u32 %v2517_v36, %v2578_v54  ;;  %v2612_v57 = vor.u32 %v275_v19, %v274_v18  ;;  %v281_v61 = vshrl.u32 %v2518_v38, %v2581_v62 }
  0x2e   :  { %v153_v20 = vmul.u32 %v151_v10, %v149_v40  ;;  %v154_v21 = vmul.u32 %v152_v11, %v149_v40  ;;  %v155_v22 = vmul.u32 %v151_v10, %v150_v1  ;;  %v156_v25 = vmul.u32 %v152_v11, %v150_v1 }
  0x2f   :  { %v175_v26 = vmul.u32 %v173_v12, %v149_v40  ;;  %v176_v27 = vmul.u32 %v174_v15, %v149_v40  ;;  %v177_v29 = vmul.u32 %v173_v12, %v150_v1  ;;  %v178_v37 = vmul.u32 %v174_v15, %v150_v1 }
  0x30   :  { %v157_v31 = vshll.u32 %v154_v21, 16  ;;  %v158_v33 = vshrl.u32 %v154_v21, 16  ;;  %v159_v35 = vshll.u32 %v155_v22, 16  ;;  %v160_v39 = vshrl.u32 %v155_v22, 16 }
  0x31   :  { %v179_v41 = vshll.u32 %v176_v27, 16  ;;  %v180_v42 = vshrl.u32 %v176_v27, 16  ;;  %v181_v43 = vshll.u32 %v177_v29, 16  ;;  %v182_v45 = vshrl.u32 %v177_v29, 16 }
  0x32   :  { %vm161_vm6 = vc.u32 %v153_v20, %v157_v31  ;;  %v163_v44 = vadd.s32 %v157_v31, %v153_v20  ;;  %v278_v40 = vshrl.u32 %v2517_v36, %v2581_v62  ;;  %v283_v0 = vshll.u32 %v2518_v38, %v2578_v54 }
  0x33   :  { %v162_v49 = vsel %vm161_vm6, 1, %v2520_v48  ;;  %vm183_vm7 = vc.u32 %v175_v26, %v179_v41  ;;  %v185_v50 = vadd.s32 %v179_v41, %v175_v26  ;;  %v284_v1 = vshrl.u32 %v2519_v47, %v2581_v62 }
  0x34   :  { %v164_v51 = vadd.s32 %v162_v49, %v156_v25  ;;  %vm165_vm8 = vc.u32 %v163_v44, %v159_v35  ;;  %v184_v52 = vsel %vm183_vm7, 1, %v2520_v48  ;;  %v279_v60 = vor.u32 %v278_v40, %v277_v23 }
  0x35   :  { %v166_v55 = vsel %vm165_vm8, 1, %v2520_v48  ;;  %v186_v56 = vadd.s32 %v184_v52, %v178_v37  ;;  %vm187_vm9 = vc.u32 %v185_v50, %v181_v43  ;;  %vm286_vm10 = vcmp.lt.s32.totalorder %v2591_v9, 1 }
  0x36   :  { %v168_v58 = vadd.s32 %v166_v55, %v164_v51  ;;  %v188_v59 = vsel %vm187_vm9, 1, %v2520_v48  ;;  %v2622_v8 = vadd.s32 %v185_v50, %v181_v43  ;;  %v282_v10 = vor.u32 %v281_v61, %v280_v53 }
  0x37   :  { %v190_v63 = vadd.s32 %v188_v59, %v186_v56  ;;  %vm288_vm11 = vcmp.lt.s32.totalorder %v2591_v9, 3  ;;  %v285_v12 = vor.u32 %v284_v1, %v283_v0  ;;  %vm287_vm12 = vcmp.lt.s32.totalorder %v2591_v9, 2 }
  0x38   :  { %v169_v7 = vadd.s32 %v168_v58, %v158_v33  ;;  %vm289_vm13 = vcmp.lt.s32.totalorder %v2591_v9, 4  ;;  %v294_v54 = vsel %vm286_vm10, %v2603_v46, %v2612_v57  ;;  %v2402_v17 = vadd.s32 4294967169, %v2563_v28 }
  0x39   :  { %v191_v11 = vadd.s32 %v190_v63, %v180_v42  ;;  %v295_v16 = vsel %vm289_vm13, %v282_v10, 920167782  ;;  %v303_v20 = vand.u32 65535, %v2584_v2  ;;  %v304_v21 = vshrl.u32 %v2584_v2, 16 }
  0x3a   :  { %v2627_v15 = vadd.s32 %v169_v7, %v160_v39  ;;  %v296_v19 = vsel %vm288_vm11, %v279_v60, %v295_v16  ;;  %v193_v22 = vmul.u32 %v2561_v24, %v2587_v4  ;;  %v298_v28 = vsel %vm286_vm10, %v2612_v57, %v279_v60 }
  0x3b   :  { %v192_v18 = vadd.s32 %v191_v11, %v182_v45  ;;  %v297_v23 = vsel %vm287_vm12, %v294_v54, %v296_v19  ;;  %v299_v26 = vsel %vm289_vm13, %v285_v12, 1326507024  ;;  %v418_v24 = vadd.s32 1, %v2402_v17 }
  0x3c   :  { %vm195_vm14 = vc.u32 %v2627_v15, %v2622_v8  ;;  %v327_v27 = vand.u32 65535, %v297_v23  ;;  %v328_v29 = vshrl.u32 %v297_v23, 16  ;;  %v300_v31 = vsel %vm288_vm11, %v282_v10, %v299_v26 }
  0x3d   :  { %v196_v25 = vadd.s32 1, %v192_v18  ;;  %v301_v33 = vsel %vm287_vm12, %v298_v28, %v300_v31  ;;  %v270_v44 = vshrl.u32 %v2514_v30, %v2581_v62  ;;  %vm419_vm0 = vcmp.gt.s32.totalorder %v418_v24, 0 }
  0x3e   :  { %v329_v35 = vmul.u32 %v327_v27, %v303_v20  ;;  %v330_v37 = vmul.u32 %v328_v29, %v303_v20  ;;  %v305_v41 = vand.u32 65535, %v301_v33  ;;  %v306_v42 = vshrl.u32 %v301_v33, 16 }
  0x3f   :  { %v197_v4 = vsel %vm195_vm14, %v196_v25, %v192_v18  ;;  %v331_v43 = vmul.u32 %v327_v27, %v304_v21  ;;  %v332_v52 = vmul.u32 %v328_v29, %v304_v21  ;;  %v408_v0 = vand.u32 2147483647, %v2555_v13 }
  0x40   :  { %v198_v39 = vadd.s32 %v197_v4, %v193_v22  ;;  %v333_v45 = vshll.u32 %v330_v37, 16  ;;  %v307_v50 = vmul.u32 %v305_v41, %v303_v20  ;;  %v308_v40 = vmul.u32 %v306_v42, %v303_v20 }
  0x41   :  { %v309_v51 = vmul.u32 %v305_v41, %v304_v21  ;;  %v310_v55 = vmul.u32 %v306_v42, %v304_v21  ;;  %v335_v58 = vshll.u32 %v331_v43, 16  ;;  %v290_v1 = vsel %vm286_vm10, %v270_v44, %v2603_v46 }
  0x42   :  { %v199_v49 = vadd.s32 536870912, %v198_v39  ;;  %vm337_vm15 = vc.u32 %v329_v35, %v333_v45  ;;  %v311_v56 = vshll.u32 %v308_v40, 16  ;;  %v339_v63 = vadd.s32 %v333_v45, %v329_v35 }
  0x43   :  { %v313_v59 = vshll.u32 %v309_v51, 16  ;;  %v338_v61 = vsel %vm337_vm15, 1, %v2520_v48  ;;  %v291_v7 = vsel %vm289_vm13, %v279_v60, 2102212464  ;;  %v420_v54 = vsel %vm419_vm0, %v418_v24, 0 }
  0x44   :  { %v2657_v53 = vshrl.u32 %v199_v49, 30  ;;  %vm315_vm1 = vc.u32 %v307_v50, %v311_v56  ;;  %v317_v11 = vadd.s32 %v311_v56, %v307_v50  ;;  %v340_v12 = vadd.s32 %v338_v61, %v332_v52 }
  0x45   :  { %v316_v10 = vsel %vm315_vm1, 1, %v2520_v48  ;;  %v334_v18 = vshrl.u32 %v330_v37, 16  ;;  %vm341_vm2 = vc.u32 %v339_v63, %v335_v58  ;;  %v312_v19 = vshrl.u32 %v308_v40, 16 }
  0x46   :  { %v201_v62 = vshll.u32 %v2657_v53, 30  ;;  %v318_v17 = vadd.s32 %v316_v10, %v310_v55  ;;  %vm319_vm3 = vc.u32 %v317_v11, %v313_v59  ;;  %v336_v20 = vshrl.u32 %v331_v43, 16 }
  0x47   :  { %v342_v21 = vsel %vm341_vm2, 1, %v2520_v48  ;;  %v320_v60 = vsel %vm319_vm3, 1, %v2520_v48  ;;  %v292_v23 = vsel %vm288_vm11, %v2612_v57, %v291_v7  ;;  %v314_v28 = vshrl.u32 %v309_v51, 16 }
  0x48   :  { %v202_v16 = vsub.s32 %v198_v39, %v201_v62  ;;  %v344_v22 = vadd.s32 %v342_v21, %v340_v12  ;;  %v322_v25 = vadd.s32 %v320_v60, %v318_v17  ;;  %v422_v26 = vand.u32 31, %v420_v54 }
  0x49   :  { %v194_v31 = vadd.s32 %v2622_v8, %v2627_v15  ;;  %v293_v35 = vsel %vm287_vm12, %v290_v1, %v292_v23  ;;  %v2680_v37 = vadd.s32 %v339_v63, %v335_v58  ;;  %v415_v57 = vand.u32 8388607, %v408_v0 }
  0x4a   :  { %vm203_vm4 = vcmp.lt.s32.totalorder %v202_v16, 0  ;;  %v204_v46 = vsub.s32 0, %v202_v16  ;;  %v345_v29 = vadd.s32 %v344_v22, %v334_v18  ;;  %v323_v4 = vadd.s32 %v322_v25, %v312_v19 }
  0x4b   :  { %v2676_v33 = vsub.s32 32, %v422_v26  ;;  %v2686_v43 = vshrl.u32 %v420_v54, 5  ;;  %v425_v8 = vshll.u32 %v2514_v30, %v422_v26  ;;  %v434_v9 = vshll.u32 %v2517_v36, %v422_v26 }
  0x4c   :  { %v205_v27 = vsel %vm203_vm4, %v204_v46, %v202_v16  ;;  %v346_v39 = vadd.s32 %v345_v29, %v336_v20  ;;  %v2684_v42 = vadd.s32 %v323_v4, %v314_v28  ;;  %v347_v49 = vmul.u32 %v2584_v2, %v293_v35 }
  0x4d   :  { %v206_v24 = vclz %v205_v27  ;;  %v426_v44 = vshrl.u32 %v2515_v32, %v2676_v33  ;;  %v435_v45 = vshrl.u32 %v2518_v38, %v2676_v33  ;;  %v428_v50 = vshll.u32 %v2515_v32, %v422_v26 }
  0x4e   :  { %v350_v15 = vadd.s32 1, %v346_v39  ;;  %v429_v40 = vshrl.u32 %v2516_v34, %v2676_v33  ;;  %vm349_vm6 = vc.u32 %v2684_v42, %v2680_v37  ;;  %v431_v52 = vshll.u32 %v2516_v34, %v422_v26 }
  0x4f   :  { %v2397_v41 = vadd.s32 4294967294, %v206_v24  ;;  %v432_v55 = vshrl.u32 %v2517_v36, %v2676_v33  ;;  %v416_v61 = vor.u32 8388608, %v415_v57  ;;  %v2703_v2 = vor.u32 %v426_v44, %v425_v8 }
  0x50   :  { %v351_v63 = vsel %vm349_vm6, %v350_v15, %v346_v39  ;;  %v436_v62 = vor.u32 %v435_v45, %v434_v9  ;;  %vm443_vm7 = vcmp.lt.s32.totalorder %v2686_v43, 4  ;;  %v2706_v11 = vor.u32 %v429_v40, %v428_v50 }
  0x51   :  { %vm2398_vm5 = vcmp.lt.s32.totalorder %v2397_v41, 0  ;;  %v352_v10 = vadd.s32 %v351_v63, %v347_v49  ;;  %v2708_v12 = vor.u32 %v432_v55, %v431_v52  ;;  %v437_v54 = vshll.u32 %v2518_v38, %v422_v26 }
  0x52   :  { %v209_v51 = vsel %vm2398_vm5, 0, %v2397_v41  ;;  %vm440_vm8 = vcmp.lt.s32.totalorder %v2686_v43, 1  ;;  %vm442_vm9 = vcmp.lt.s32.totalorder %v2686_v43, 3  ;;  %vm441_vm10 = vcmp.lt.s32.totalorder %v2686_v43, 2 }
  0x53   :  { %v210_v56 = vsub.s32 32, %v209_v51  ;;  %v211_v58 = vshll.u32 %v202_v16, %v209_v51  ;;  %v214_v59 = vsub.s32 4294967266, %v209_v51  ;;  %v438_v16 = vshrl.u32 %v2519_v47, %v2676_v33 }
  0x54   :  { %v353_v19 = vadd.s32 536870912, %v352_v10  ;;  %v449_v21 = vsel %vm443_vm7, %v436_v62, 920167782  ;;  %v448_v23 = vsel %vm440_vm8, %v2703_v2, %v2706_v11  ;;  %v452_v25 = vsel %vm440_vm8, %v2706_v11, %v2708_v12 }
  0x55   :  { %v212_v1 = vshrl.u32 %v194_v31, %v210_v56  ;;  %v215_v7 = vadd.s32 127, %v214_v59  ;;  %v439_v20 = vor.u32 %v438_v16, %v437_v54  ;;  %v450_v28 = vsel %vm442_vm9, %v2708_v12, %v449_v21 }
  0x56   :  { %v2718_v22 = vshrl.u32 %v353_v19, 30  ;;  %v2733_v27 = vshll.u32 %v416_v61, 8  ;;  %v451_v8 = vsel %vm441_vm10, %v448_v23, %v450_v28  ;;  %vm102_vm11 = vcmp.lt.s32.totalorder %v2546_v3, 0  ;;  %v89_v19 = vld [vmem:[#allocation6 + $0x18] sm:$0xff] }
  0x57   :  { %v213_v17 = vor.u32 %v212_v1, %v211_v58  ;;  %v216_v18 = vshll.u32 %v215_v7, 23  ;;  %v453_v26 = vsel %vm443_vm7, %v439_v20, 1326507024  ;;  %vm2749_vm12 = vcmp.le.f32.partialorder %v100_v6, 0.7853982 }
  0x58   :  { %v355_v31 = vshll.u32 %v2718_v22, 30  ;;  %v454_v24 = vsel %vm442_vm9, %v436_v62, %v453_v26  ;;  %v457_v35 = vand.u32 65535, %v2733_v27  ;;  %v458_v39 = vshrl.u32 %v2733_v27, 16 }
  0x59   :  { %v217_v46 = vor.u32 4788187, %v216_v18  ;;  %v220_v60 = vcvt.s32.f32 %v213_v17  ;;  %v455_v4 = vsel %vm441_vm10, %v452_v25, %v454_v24  ;;  %v482_v52 = vshrl.u32 %v451_v8, 16 }
  0x5a   :  { %v356_v41 = vsub.s32 %v352_v10, %v355_v31  ;;  %v459_v15 = vand.u32 65535, %v455_v4  ;;  %v460_v44 = vshrl.u32 %v455_v4, 16  ;;  %v481_v61 = vand.u32 65535, %v451_v8 }
  0x5b   :  { %v218_v29 = vand.u32 2147483647, %v217_v46  ;;  %v2767_v54 = vmul.u32 %v482_v52, %v457_v35  ;;  %v90_v20 = vstv %s2744_s21  ;;  %v348_v21 = vadd.s32 %v2680_v37, %v2684_v42  ;;  %s2057_s21 = smul.f32 %s3410_s7, %s3494_s17 }
  0x5c   :  { %vm357_vm13 = vcmp.lt.s32.totalorder %v356_v41, 0  ;;  %v358_v49 = vsub.s32 0, %v356_v41  ;;  %v461_v50 = vmul.u32 %v459_v15, %v457_v35  ;;  %v462_v40 = vmul.u32 %v460_v44, %v457_v35 }
  0x5d   :  { %v221_v57 = vmul.f32 %v220_v60, %v218_v29  ;;  %v2753_v51 = vmul.u32 %v459_v15, %v458_v39  ;;  %v464_v62 = vmul.u32 %v460_v44, %v458_v39  ;;  %v483_v46 = vmul.u32 %v481_v61, %v457_v35 }
  0x5e   :  { %v359_v56 = vsel %vm357_vm13, %v358_v49, %v356_v41  ;;  %v465_v59 = vshll.u32 %v462_v40, 16  ;;  %v485_v28 = vmul.u32 %v481_v61, %v458_v39  ;;  %v487_v31 = vshll.u32 %v2767_v54, 16 }
  0x5f   :  { %v222_v45 = vxor.u32 2147483648, %v221_v57  ;;  %v360_v58 = vclz %v359_v56  ;;  %v467_v1 = vshll.u32 %v2753_v51, 16  ;;  %v2776_v24 = vsub.f32 %v89_v19, %v90_v20 }
  0x60   :  { %vm469_vm14 = vc.u32 %v461_v50, %v465_v59  ;;  %v471_v10 = vadd.s32 %v465_v59, %v461_v50  ;;  %v486_v37 = vmul.u32 %v482_v52, %v458_v39  ;;  %v224_v42 = vsub.s32 4, %v2657_v53 }
  0x61   :  { %v223_v55 = vsel %vm102_vm11, %v222_v45, %v221_v57  ;;  %v2400_v7 = vadd.s32 4294967294, %v360_v58  ;;  %v470_v18 = vsel %vm469_vm14, 1, %v2520_v48  ;;  %v424_v35 = vshrl.u32 %v2514_v30, %v2676_v33 }
  0x62   :  { %v2760_v6 = vsel %vm2749_vm12, %v2546_v3, %v223_v55  ;;  %v472_v23 = vadd.s32 %v470_v18, %v464_v62  ;;  %vm473_vm0 = vc.u32 %v471_v10, %v467_v1  ;;  %v466_v45 = vshrl.u32 %v462_v40, 16 }
  0x63   :  { %v2764_v63 = vmul.f32 %v2760_v6, %v2760_v6  ;;  %vm2401_vm15 = vcmp.lt.s32.totalorder %v2400_v7, 0  ;;  %v474_v44 = vsel %vm473_vm0, 1, %v2520_v48  ;;  %v489_v55 = vshll.u32 %v485_v28, 16 }
  0x64   :  { %v363_v60 = vsel %vm2401_vm15, 0, %v2400_v7  ;;  %v476_v49 = vadd.s32 %v474_v44, %v472_v23  ;;  %vm491_vm1 = vc.u32 %v483_v46, %v487_v31  ;;  %v445_v39 = vsel %vm443_vm7, %v2708_v12, 2102212464 }
  0x65   :  { %v229_v16 = vmul.f32 -0.001358992, %v2764_v63  ;;  %v236_v17 = vmul.f32 -0.00019511016, %v2764_v63  ;;  %v364_v25 = vsub.s32 32, %v363_v60  ;;  %v365_v26 = vshll.u32 %v356_v41, %v363_v60 }
  0x66   :  { %v368_v29 = vsub.s32 4294967266, %v363_v60  ;;  %v492_v52 = vsel %vm491_vm1, 1, %v2520_v48  ;;  %v493_v59 = vadd.s32 %v487_v31, %v483_v46  ;;  %vm256_vm2 = vcmp.lt.s32.totalorder %v2548_v5, 0 }
  0x67   :  { %v230_v4 = vadd.f32 0.041655596, %v229_v16  ;;  %v237_v57 = vadd.f32 0.008332121, %v236_v17  ;;  %v366_v8 = vshrl.u32 %v348_v21, %v364_v25  ;;  %v494_v61 = vadd.s32 %v492_v52, %v486_v37 }
  0x68   :  { %v369_v15 = vadd.s32 127, %v368_v29  ;;  %v444_v62 = vsel %vm440_vm8, %v424_v35, %v2703_v2  ;;  %v468_v1 = vshrl.u32 %v2753_v51, 16  ;;  %v477_v7 = vadd.s32 %v476_v49, %v466_v45 }
  0x69   :  { %v367_v41 = vor.u32 %v366_v8, %v365_v26  ;;  %v231_v56 = vmul.f32 %v230_v4, %v2764_v63  ;;  %v238_v58 = vmul.f32 %v237_v57, %v2764_v63  ;;  %v446_v12 = vsel %vm442_vm9, %v2706_v11, %v445_v39 }
  0x6a   :  { %v370_v50 = vshll.u32 %v369_v15, 23  ;;  %v488_v16 = vshrl.u32 %v2767_v54, 16  ;;  %vm495_vm3 = vc.u32 %v493_v59, %v489_v55  ;;  %v565_v20 = vand.u32 2139095040, %v2776_v24 }
  0x6b   :  { %v374_v40 = vcvt.s32.f32 %v367_v41  ;;  %v232_v17 = vadd.f32 -0.4999988, %v231_v56  ;;  %v239_v18 = vadd.f32 -0.16666654, %v238_v58  ;;  %v496_v19 = vsel %vm495_vm3, 1, %v2520_v48  ;;  %v97_v41 = vld [vmem:[#allocation6 + $0x28] sm:$0xff] }
  0x6c   :  { %v371_v33 = vor.u32 4788187, %v370_v50  ;;  %vm2805_vm4 = vcmp.le.f32.partialorder %v254_v14, 0.7853982  ;;  %v490_v21 = vshrl.u32 %v485_v28, 16  ;;  %v498_v11 = vadd.s32 %v496_v19, %v494_v61 }
  0x6d   :  { %v225_v54 = vsel %vm102_vm11, %v224_v42, %v2657_v53  ;;  %v478_v46 = vadd.s32 %v477_v7, %v468_v1  ;;  %v497_v60 = vadd.s32 %v493_v59, %v489_v55  ;;  %v566_v23 = vshrl.u32 %v565_v20, 23 }
  0x6e   :  { %v372_v10 = vand.u32 2147483647, %v371_v33  ;;  %v378_v26 = vsub.s32 4, %v2718_v22  ;;  %v447_v14 = vsel %vm441_vm10, %v444_v62, %v446_v12  ;;  %v499_v29 = vadd.s32 %v498_v11, %v488_v16 }
  0x6f   :  { %v94_v31 = vstv %s2782_s22  ;;  %v233_v4 = vmul.f32 %v232_v17, %v2764_v63  ;;  %v240_v28 = vmul.f32 %v239_v18, %v2764_v63  ;;  %v2405_v57 = vadd.s32 4294967169, %v566_v23  ;;  %v93_v63 = vld [vmem:[#allocation6 + $0x20] sm:$0xff]  ;;  %s3537_s22 = sld [smem:[#allocation2 + $0xe]] }
  0x70   :  { %v375_v51 = vmul.f32 %v374_v40, %v372_v10  ;;  %v98_v8 = vstv %s2790_s23  ;;  %v2821_v53 = vsel %vm2749_vm12, 0, %v225_v54  ;;  %v500_v44 = vadd.s32 %v499_v29, %v490_v21  ;;  %s3542_s23 = sld [smem:[#allocation2 + $0x14]] }
  0x71   :  { %v501_v37 = vmul.u32 %v2733_v27, %v447_v14  ;;  %vm503_vm5 = vc.u32 %v478_v46, %v497_v60  ;;  %v572_v42 = vadd.s32 1, %v2405_v57  ;;  %v2832_v35 = vand.u32 3, %v2821_v53 }
  0x72   :  { %v376_v25 = vxor.u32 2147483648, %v375_v51  ;;  %v379_v9 = vsel %vm256_vm2, %v378_v26, %v2718_v22  ;;  %v504_v49 = vadd.s32 1, %v500_v44  ;;  %v2841_v50 = vadd.f32 1.0, %v233_v4 }
  0x73   :  { %v241_v55 = vadd.f32 1.0, %v240_v28  ;;  %v562_v27 = vand.u32 2147483647, %v2776_v24  ;;  %vm573_vm6 = vcmp.gt.s32.totalorder %v572_v42, 0  ;;  %v2846_v33 = vsub.f32 %v93_v63, %v94_v31 }
  0x74   :  { %v377_v15 = vsel %vm256_vm2, %v376_v25, %v375_v51  ;;  %v505_v39 = vsel %vm503_vm5, %v504_v49, %v500_v44  ;;  %v574_v52 = vsel %vm573_vm6, %v572_v42, 0  ;;  %v2848_v59 = vsub.f32 %v97_v41, %v98_v8 }
  0x75   :  { %v2828_v43 = vsel %vm2805_vm4, %v2548_v5, %v377_v15  ;;  %v506_v22 = vadd.s32 %v505_v39, %v501_v37  ;;  %v576_v40 = vand.u32 31, %v574_v52  ;;  %vm249_vm7 = vcmp.eq.s32.totalorder %v2832_v35, 2  ;;  %s2080_s3 = smul.f32 %s3537_s22, %s3517_s20 }
  0x76   :  { %v2839_v45 = vmul.f32 %v2828_v43, %v2828_v43  ;;  %v2852_v62 = vmul.f32 %v241_v55, %v2760_v6  ;;  %v2856_v1 = vsel %vm2805_vm4, 0, %v379_v9  ;;  %v3821_v12 = vxor.u32 2147483648, %v2841_v50 }
  0x77   :  { %v507_v7 = vadd.s32 536870912, %v506_v22  ;;  %v577_v10 = vsub.s32 32, %v576_v40  ;;  %v2860_v17 = vand.u32 3, %v2856_v1  ;;  %v569_v18 = vand.u32 8388607, %v562_v27 }
  0x78   :  { %v383_v56 = vmul.f32 -0.001358992, %v2839_v45  ;;  %v390_v58 = vmul.f32 -0.00019511016, %v2839_v45  ;;  %v2864_v19 = vadd.s32 %v497_v60, %v478_v46  ;;  %v582_v6 = vshll.u32 %v2515_v32, %v576_v40 }
  0x79   :  { %v2866_v20 = vshrl.u32 %v507_v7, 30  ;;  %v719_v2 = vand.u32 2139095040, %v2846_v33  ;;  %v583_v21 = vshrl.u32 %v2516_v34, %v577_v10  ;;  %v585_v11 = vshll.u32 %v2516_v34, %v576_v40 }
  0x7a   :  { %v384_v61 = vadd.f32 0.041655596, %v383_v56  ;;  %v391_v16 = vadd.f32 0.008332121, %v390_v58  ;;  %v586_v54 = vshrl.u32 %v2517_v36, %v577_v10  ;;  %v3823_v23 = vxor.u32 2147483648, %v2852_v62 }
  0x7b   :  { %v509_v25 = vshll.u32 %v2866_v20, 30  ;;  %v588_v46 = vshll.u32 %v2517_v36, %v576_v40  ;;  %v589_v60 = vshrl.u32 %v2518_v38, %v577_v10  ;;  %v570_v14 = vor.u32 8388608, %v569_v18 }
  0x7c   :  { %v385_v51 = vmul.f32 %v384_v61, %v2839_v45  ;;  %v392_v26 = vmul.f32 %v391_v16, %v2839_v45  ;;  %v2879_v29 = vshrl.u32 %v574_v52, 5  ;;  %v579_v31 = vshll.u32 %v2514_v30, %v576_v40 }
  0x7d   :  { %v2882_v4 = vsub.s32 %v506_v22, %v509_v25  ;;  %v580_v28 = vshrl.u32 %v2515_v32, %v577_v10  ;;  %v591_v57 = vshll.u32 %v2518_v38, %v576_v40  ;;  %v592_v8 = vshrl.u32 %v2519_v47, %v577_v10 }
  0x7e   :  { %v386_v15 = vadd.f32 -0.4999988, %v385_v51  ;;  %v584_v44 = vor.u32 %v583_v21, %v582_v6  ;;  %v587_v37 = vor.u32 %v586_v54, %v585_v11  ;;  %v720_v42 = vshrl.u32 %v719_v2, 23 }
  0x7f   :  { %vm511_vm8 = vcmp.lt.s32.totalorder %v2882_v4, 0  ;;  %v512_v63 = vsub.s32 0, %v2882_v4  ;;  %v590_v9 = vor.u32 %v589_v60, %v588_v46  ;;  %v593_v49 = vor.u32 %v592_v8, %v591_v57 }
  0x80   :  { %v2894_v41 = vsel %vm249_vm7, %v3821_v12, %v2852_v62  ;;  %vm594_vm9 = vcmp.lt.s32.totalorder %v2879_v29, 1  ;;  %vm597_vm10 = vcmp.lt.s32.totalorder %v2879_v29, 4  ;;  %v2898_v55 = vshll.u32 %v570_v14, 8 }
  0x81   :  { %v393_v56 = vadd.f32 -0.16666654, %v392_v26  ;;  %v513_v58 = vsel %vm511_vm8, %v512_v63, %v2882_v4  ;;  %v581_v39 = vor.u32 %v580_v28, %v579_v31  ;;  %vm596_vm11 = vcmp.lt.s32.totalorder %v2879_v29, 3 }
  0x82   :  { %v387_v52 = vmul.f32 %v386_v15, %v2839_v45  ;;  %v514_v22 = vclz %v513_v58  ;;  %vm595_vm12 = vcmp.lt.s32.totalorder %v2879_v29, 2  ;;  %v2408_v40 = vadd.s32 4294967169, %v720_v42 }
  0x83   :  { %v603_v61 = vsel %vm597_vm10, %v590_v9, 920167782  ;;  %v606_v7 = vsel %vm594_vm9, %v584_v44, %v587_v37  ;;  %v607_v16 = vsel %vm597_vm10, %v593_v49, 1326507024  ;;  %v716_v18 = vand.u32 2147483647, %v2846_v33 }
  0x84   :  { %v2403_v6 = vadd.s32 4294967294, %v514_v22  ;;  %v578_v2 = vshrl.u32 %v2514_v30, %v577_v10  ;;  %v608_v51 = vsel %vm596_vm11, %v590_v9, %v607_v16  ;;  %v611_v21 = vand.u32 65535, %v2898_v55 }
  0x85   :  { %v394_v11 = vmul.f32 %v393_v56, %v2839_v45  ;;  %v602_v54 = vsel %vm594_vm9, %v581_v39, %v584_v44  ;;  %v604_v25 = vsel %vm596_vm11, %v587_v37, %v603_v61  ;;  %v609_v46 = vsel %vm595_vm12, %v606_v7, %v608_v51 }
  0x86   :  { %v2922_v60 = vadd.f32 1.0, %v387_v52  ;;  %vm2404_vm13 = vcmp.lt.s32.totalorder %v2403_v6, 0  ;;  %v612_v10 = vshrl.u32 %v2898_v55, 16  ;;  %v726_v26 = vadd.s32 1, %v2408_v40 }
  0x87   :  { %v517_v14 = vsel %vm2404_vm13, 0, %v2403_v6  ;;  %v599_v31 = vsel %vm597_vm10, %v587_v37, 2102212464  ;;  %v613_v45 = vand.u32 65535, %v609_v46  ;;  %v614_v28 = vshrl.u32 %v609_v46, 16 }
  0x88   :  { %v518_v57 = vsub.s32 32, %v517_v14  ;;  %v519_v8 = vshll.u32 %v2882_v4, %v517_v14  ;;  %v522_v15 = vsub.s32 4294967266, %v517_v14  ;;  %v605_v42 = vsel %vm595_vm12, %v602_v54, %v604_v25 }
  0x89   :  { %v395_v63 = vadd.f32 1.0, %v394_v11  ;;  %v598_v9 = vsel %vm594_vm9, %v578_v2, %v581_v39  ;;  %v615_v49 = vmul.u32 %v613_v45, %v611_v21  ;;  %v616_v56 = vmul.u32 %v614_v28, %v611_v21 }
  0x8a   :  { %v520_v58 = vshrl.u32 %v2864_v19, %v518_v57  ;;  %v523_v52 = vadd.s32 127, %v522_v15  ;;  %v600_v37 = vsel %vm596_vm11, %v584_v44, %v599_v31  ;;  %v617_v22 = vmul.u32 %v613_v45, %v612_v10 }
  0x8b   :  { %vm410_vm14 = vcmp.lt.s32.totalorder %v2555_v13, 0  ;;  %v618_v4 = vmul.u32 %v614_v28, %v612_v10  ;;  %v619_v40 = vshll.u32 %v616_v56, 16  ;;  %v635_v61 = vand.u32 65535, %v605_v42 }
  0x8c   :  { %v636_v7 = vshrl.u32 %v605_v42, 16  ;;  %vm2938_vm15 = vcmp.le.f32.partialorder %v408_v0, 0.7853982  ;;  %v521_v39 = vor.u32 %v520_v58, %v519_v8  ;;  %v524_v6 = vshll.u32 %v523_v52, 23 }
  0x8d   :  { %v620_v19 = vshrl.u32 %v616_v56, 16  ;;  %v621_v2 = vshll.u32 %v617_v22, 16  ;;  %vm623_vm0 = vc.u32 %v615_v49, %v619_v40  ;;  %v625_v51 = vadd.s32 %v619_v40, %v615_v49 }
  0x8e   :  { %v637_v44 = vmul.u32 %v635_v61, %v611_v21  ;;  %v638_v11 = vmul.u32 %v636_v7, %v611_v21  ;;  %v525_v54 = vor.u32 4788187, %v524_v6  ;;  %v528_v25 = vcvt.s32.f32 %v521_v39 }
  0x8f   :  { %v624_v46 = vsel %vm623_vm0, 1, %v2520_v48  ;;  %v639_v14 = vmul.u32 %v635_v61, %v612_v10  ;;  %vm627_vm1 = vc.u32 %v625_v51, %v621_v2  ;;  %v640_v45 = vmul.u32 %v636_v7, %v612_v10 }
  0x90   :  { %v626_v31 = vadd.s32 %v624_v46, %v618_v4  ;;  %v641_v0 = vshll.u32 %v638_v11, 16  ;;  %v2944_v28 = vmul.f32 %v395_v63, %v2828_v43  ;;  %v526_v57 = vand.u32 2147483647, %v525_v54 }
  0x91   :  { %v628_v8 = vsel %vm627_vm1, 1, %v2520_v48  ;;  %v643_v15 = vshll.u32 %v639_v14, 16  ;;  %vm246_vm2 = vcmp.eq.s32.totalorder %v2832_v35, 0  ;;  %v622_v42 = vshrl.u32 %v617_v22, 16 }
  0x92   :  { %v630_v21 = vadd.s32 %v628_v8, %v626_v31  ;;  %vm645_vm3 = vc.u32 %v637_v44, %v641_v0  ;;  %v647_v49 = vadd.s32 %v641_v0, %v637_v44  ;;  %vm403_vm4 = vcmp.eq.s32.totalorder %v2860_v17, 2 }
  0x93   :  { %v529_v56 = vmul.f32 %v528_v25, %v526_v57  ;;  %v601_v10 = vsel %vm595_vm12, %v598_v9, %v600_v37  ;;  %v646_v58 = vsel %vm645_vm3, 1, %v2520_v48  ;;  %vm727_vm5 = vcmp.gt.s32.totalorder %v726_v26, 0 }
  0x94   :  { %vm400_vm6 = vcmp.eq.s32.totalorder %v2860_v17, 0  ;;  %v631_v43 = vadd.s32 %v630_v21, %v620_v19  ;;  %v642_v63 = vshrl.u32 %v638_v11, 16  ;;  %v648_v52 = vadd.s32 %v646_v58, %v640_v45 }
  0x95   :  { %vm649_vm7 = vc.u32 %v647_v49, %v643_v15  ;;  %v530_v4 = vxor.u32 2147483648, %v529_v56  ;;  %v2954_v40 = vadd.s32 %v647_v49, %v643_v15  ;;  %v728_v61 = vsel %vm727_vm5, %v726_v26, 0 }
  0x96   :  { %v650_v22 = vsel %vm649_vm7, 1, %v2520_v48  ;;  %v2956_v7 = vadd.s32 %v631_v43, %v622_v42  ;;  %v644_v39 = vshrl.u32 %v639_v14, 16  ;;  %v730_v9 = vand.u32 31, %v728_v61 }
  0x97   :  { %v652_v29 = vadd.s32 %v650_v22, %v648_v52  ;;  %vm245_vm8 = vcmp.lt.s32.totalorder %v2832_v35, 2  ;;  %vm399_vm9 = vcmp.lt.s32.totalorder %v2860_v17, 2  ;;  %v3822_v37 = vxor.u32 2147483648, %v2944_v28 }
  0x98   :  { %v3820_v6 = vxor.u32 2147483648, %v2922_v60  ;;  %v531_v19 = vsel %vm410_vm14, %v530_v4, %v529_v56  ;;  %v723_v2 = vand.u32 8388607, %v716_v18  ;;  %v655_v44 = vmul.u32 %v2898_v55, %v601_v10 }
  0x99   :  { %v2969_v26 = vsel %vm2938_vm15, %v2555_v13, %v531_v19  ;;  %v653_v51 = vadd.s32 %v652_v29, %v642_v63  ;;  %v2972_v11 = vshrl.u32 %v728_v61, 5  ;;  %vm657_vm10 = vc.u32 %v2956_v7, %v2954_v40 }
  0x9a   :  { %v2976_v54 = vmul.f32 %v2969_v26, %v2969_v26  ;;  %v731_v25 = vsub.s32 32, %v730_v9  ;;  %v733_v46 = vshll.u32 %v2514_v30, %v730_v9  ;;  %v736_v31 = vshll.u32 %v2515_v32, %v730_v9 }
  0x9b   :  { %v654_v14 = vadd.s32 %v653_v51, %v644_v39  ;;  %v739_v45 = vshll.u32 %v2516_v34, %v730_v9  ;;  %v742_v0 = vshll.u32 %v2517_v36, %v730_v9  ;;  %v745_v15 = vshll.u32 %v2518_v38, %v730_v9 }
  0x9c   :  { %v537_v55 = vmul.f32 -0.001358992, %v2976_v54  ;;  %v544_v57 = vmul.f32 -0.00019511016, %v2976_v54  ;;  %v734_v8 = vshrl.u32 %v2515_v32, %v731_v25  ;;  %vm397_vm11 = vweird.f32 %v2548_v5 }
  0x9d   :  { %v658_v42 = vadd.s32 1, %v654_v14  ;;  %v737_v21 = vshrl.u32 %v2516_v34, %v731_v25  ;;  %v740_v49 = vshrl.u32 %v2517_v36, %v731_v25  ;;  %v743_v56 = vshrl.u32 %v2518_v38, %v731_v25 }
  0x9e   :  { %v248_v10 = vsel %vm246_vm2, %v2841_v50, %v3823_v23  ;;  %v538_v58 = vadd.f32 0.041655596, %v537_v55  ;;  %v724_v43 = vor.u32 8388608, %v723_v2  ;;  %v746_v63 = vshrl.u32 %v2519_v47, %v731_v25 }
  0x9f   :  { %v405_v52 = vsel %vm403_vm4, %v3820_v6, %v2944_v28  ;;  %v532_v4 = vsub.s32 4, %v2866_v20  ;;  %v659_v22 = vsel %vm657_vm10, %v658_v42, %v654_v14  ;;  %v744_v61 = vor.u32 %v743_v56, %v742_v0 }
  0xa0   :  { %v402_v39 = vsel %vm400_vm6, %v2922_v60, %v3822_v37  ;;  %v545_v29 = vadd.f32 0.008332121, %v544_v57  ;;  %v660_v9 = vadd.s32 %v659_v22, %v655_v44  ;;  %v735_v19 = vor.u32 %v734_v8, %v733_v46 }
  0xa1   :  { %v738_v2 = vor.u32 %v737_v21, %v736_v31  ;;  %v741_v51 = vor.u32 %v740_v49, %v739_v45  ;;  %v747_v55 = vor.u32 %v746_v63, %v745_v15  ;;  %vm751_vm12 = vcmp.lt.s32.totalorder %v2972_v11, 4 }
  0xa2   :  { %v539_v6 = vmul.f32 %v538_v58, %v2976_v54  ;;  %v661_v12 = vadd.s32 536870912, %v660_v9  ;;  %vm748_vm13 = vcmp.lt.s32.totalorder %v2972_v11, 1  ;;  %vm750_vm0 = vcmp.lt.s32.totalorder %v2972_v11, 3 }
  0xa3   :  { %v252_v14 = vsel %vm245_vm8, %v248_v10, %v2894_v41  ;;  %v406_v44 = vsel %vm399_vm9, %v402_v39, %v405_v52  ;;  %v533_v46 = vsel %vm410_vm14, %v532_v4, %v2866_v20  ;;  %v757_v31 = vsel %vm751_vm12, %v744_v61, 920167782 }
  0xa4   :  { %v546_v45 = vmul.f32 %v545_v29, %v2976_v54  ;;  %v3027_v0 = vshrl.u32 %v661_v12, 30  ;;  %v732_v57 = vshrl.u32 %v2514_v30, %v731_v25  ;;  %v3030_v8 = vshll.u32 %v724_v43, 8 }
  0xa5   :  { %vm749_vm1 = vcmp.lt.s32.totalorder %v2972_v11, 2  ;;  %v756_v35 = vsel %vm748_vm13, %v735_v19, %v738_v2  ;;  %v758_v17 = vsel %vm750_vm0, %v741_v51, %v757_v31  ;;  %v761_v20 = vsel %vm751_vm12, %v747_v55, 1326507024 }
  0xa6   :  { %vm243_vm14 = vweird.f32 %v2546_v3  ;;  %v540_v41 = vadd.f32 -0.4999988, %v539_v6  ;;  %v663_v12 = vshll.u32 %v3027_v0, 30  ;;  %v760_v25 = vsel %vm748_vm13, %v738_v2, %v741_v51 }
  0xa7   :  { %v3045_v15 = vsel %vm243_vm14, nan, %v252_v14  ;;  %v3049_v42 = vsel %vm2938_vm15, 0, %v533_v46  ;;  %v753_v21 = vsel %vm751_vm12, %v741_v51, 2102212464  ;;  %v762_v49 = vsel %vm750_vm0, %v744_v61, %v761_v20 }
  0xa8   :  { %v3057_v6 = vsel %vm397_vm11, nan, %v406_v44  ;;  %v547_v56 = vadd.f32 -0.16666654, %v546_v45  ;;  %v664_v10 = vsub.s32 %v660_v9, %v663_v12  ;;  %v759_v58 = vsel %vm749_vm1, %v756_v35, %v758_v17 }
  0xa9   :  { %v752_v16 = vsel %vm748_vm13, %v732_v57, %v735_v19  ;;  %v763_v43 = vsel %vm749_vm1, %v760_v25, %v762_v49  ;;  %v765_v63 = vand.u32 65535, %v3030_v8  ;;  %v766_v52 = vshrl.u32 %v3030_v8, 16 }
  0xaa   :  { %v541_v4 = vmul.f32 %v540_v41, %v2976_v54  ;;  %vm665_vm15 = vcmp.lt.s32.totalorder %v664_v10, 0  ;;  %v666_v22 = vsub.s32 0, %v664_v10  ;;  %v754_v61 = vsel %vm750_vm0, %v738_v2, %v753_v21 }
  0xab   :  { %v767_v39 = vand.u32 65535, %v763_v43  ;;  %v768_v29 = vshrl.u32 %v763_v43, 16  ;;  %v790_v9 = vshrl.u32 %v759_v58, 16  ;;  %v873_v51 = vand.u32 2139095040, %v2848_v59 }
  0xac   :  { %v548_v19 = vmul.f32 %v547_v56, %v2976_v54  ;;  %v3073_v55 = vand.u32 3, %v3049_v42  ;;  %vm564_vm2 = vcmp.lt.s32.totalorder %v2776_v24, 0  ;;  %v667_v14 = vsel %vm665_vm15, %v666_v22, %v664_v10 }
  0xad   :  { %v870_v44 = vand.u32 2147483647, %v2848_v59  ;;  %v668_v46 = vclz %v667_v14  ;;  %v769_v31 = vmul.u32 %v767_v39, %v765_v63  ;;  %v770_v45 = vmul.u32 %v768_v29, %v765_v63 }
  0xae   :  { %v789_v57 = vand.u32 65535, %v759_v58  ;;  %v3077_v2 = vadd.f32 1.0, %v541_v4  ;;  %v656_v35 = vadd.s32 %v2954_v40, %v2956_v7  ;;  %v3083_v54 = vsel %vm749_vm1, %v752_v16, %v754_v61 }
  0xaf   :  { %v771_v17 = vmul.u32 %v767_v39, %v766_v52  ;;  %v2406_v20 = vadd.s32 4294967294, %v668_v46  ;;  %v773_v41 = vshll.u32 %v770_v45, 16  ;;  %v792_v12 = vmul.u32 %v790_v9, %v765_v63 }
  0xb0   :  { %v874_v25 = vshrl.u32 %v873_v51, 23  ;;  %v549_v21 = vadd.f32 1.0, %v548_v19  ;;  %v686_v49 = vsub.s32 4, %v3027_v0  ;;  %v772_v56 = vmul.u32 %v768_v29, %v766_v52 }
  0xb1   :  { %v775_v43 = vshll.u32 %v771_v17, 16  ;;  %vm2407_vm3 = vcmp.lt.s32.totalorder %v2406_v20, 0  ;;  %vm777_vm4 = vc.u32 %v769_v31, %v773_v41  ;;  %v791_v58 = vmul.u32 %v789_v57, %v765_v63 }
  0xb2   :  { %v793_v4 = vmul.u32 %v789_v57, %v766_v52  ;;  %v671_v22 = vsel %vm2407_vm3, 0, %v2406_v20  ;;  %v778_v40 = vsel %vm777_vm4, 1, %v2520_v48  ;;  %v779_v7 = vadd.s32 %v773_v41, %v769_v31 }
  0xb3   :  { %v795_v11 = vshll.u32 %v792_v12, 16  ;;  %vm3089_vm5 = vcmp.le.f32.partialorder %v562_v27, 0.7853982  ;;  %v672_v61 = vsub.s32 32, %v671_v22  ;;  %v673_v39 = vshll.u32 %v664_v10, %v671_v22 }
  0xb4   :  { %v676_v51 = vsub.s32 4294967266, %v671_v22  ;;  %v2411_v29 = vadd.s32 4294967169, %v874_v25  ;;  %v774_v19 = vshrl.u32 %v770_v45, 16  ;;  %v780_v14 = vadd.s32 %v778_v40, %v772_v56 }
  0xb5   :  { %vm781_vm6 = vc.u32 %v779_v7, %v775_v43  ;;  %v794_v63 = vmul.u32 %v790_v9, %v766_v52  ;;  %v674_v46 = vshrl.u32 %v656_v35, %v672_v61  ;;  %v687_v31 = vsel %vm564_vm2, %v686_v49, %v3027_v0 }
  0xb6   :  { %v677_v57 = vadd.s32 127, %v676_v51  ;;  %v782_v20 = vsel %vm781_vm6, 1, %v2520_v48  ;;  %v776_v27 = vshrl.u32 %v771_v17, 16  ;;  %v797_v37 = vshll.u32 %v793_v4, 16 }
  0xb7   :  { %v784_v41 = vadd.s32 %v782_v20, %v780_v14  ;;  %vm799_vm7 = vc.u32 %v791_v58, %v795_v11  ;;  %v675_v23 = vor.u32 %v674_v46, %v673_v39  ;;  %v801_v45 = vadd.s32 %v795_v11, %v791_v58 }
  0xb8   :  { %v678_v10 = vshll.u32 %v677_v57, 23  ;;  %v800_v25 = vsel %vm799_vm7, 1, %v2520_v48  ;;  %v796_v43 = vshrl.u32 %v792_v12, 16  ;;  %v880_v9 = vadd.s32 1, %v2411_v29 }
  0xb9   :  { %v785_v56 = vadd.s32 %v784_v41, %v774_v19  ;;  %v802_v52 = vadd.s32 %v800_v25, %v794_v63  ;;  %v682_v22 = vcvt.s32.f32 %v675_v23  ;;  %vm803_vm8 = vc.u32 %v801_v45, %v797_v37 }
  0xba   :  { %v679_v35 = vor.u32 4788187, %v678_v10  ;;  %v3098_v40 = vadd.s32 %v801_v45, %v797_v37  ;;  %v804_v17 = vsel %vm803_vm8, 1, %v2520_v48  ;;  %v809_v49 = vmul.u32 %v3030_v8, %v3083_v54 }
  0xbb   :  { %v3100_v0 = vadd.s32 %v785_v56, %v776_v27  ;;  %vm881_vm9 = vcmp.gt.s32.totalorder %v880_v9, 0  ;;  %vm554_vm10 = vcmp.eq.s32.totalorder %v3073_v55, 0  ;;  %vm557_vm12 = vcmp.eq.s32.totalorder %v3073_v55, 2 }
  0xbc   :  { %v680_v12 = vand.u32 2147483647, %v679_v35  ;;  %v798_v58 = vshrl.u32 %v793_v4, 16  ;;  %v806_v7 = vadd.s32 %v804_v17, %v802_v52  ;;  %v882_v11 = vsel %vm881_vm9, %v880_v9, 0 }
  0xbd   :  { %v3108_v23 = vmul.f32 %v549_v21, %v2969_v26  ;;  %v558_v37 = vxor.u32 2147483648, %v3077_v2  ;;  %v3113_v61 = vsel %vm3089_vm5, 0, %v687_v31  ;;  %v884_v39 = vand.u32 31, %v882_v11 }
  0xbe   :  { %v683_v8 = vmul.f32 %v682_v22, %v680_v12  ;;  %v807_v54 = vadd.s32 %v806_v7, %v796_v43  ;;  %vm811_vm13 = vc.u32 %v3100_v0, %v3098_v40  ;;  %v877_v4 = vand.u32 8388607, %v870_v44 }
  0xbf   :  { %v3119_v51 = vshrl.u32 %v882_v11, 5  ;;  %v885_v29 = vsub.s32 32, %v884_v39  ;;  %v887_v26 = vshll.u32 %v2514_v30, %v884_v39  ;;  %v890_v21 = vshll.u32 %v2515_v32, %v884_v39 }
  0xc0   :  { %v684_v19 = vxor.u32 2147483648, %v683_v8  ;;  %v808_v14 = vadd.s32 %v807_v54, %v798_v58  ;;  %v893_v63 = vshll.u32 %v2516_v34, %v884_v39  ;;  %v896_v46 = vshll.u32 %v2517_v36, %v884_v39 }
  0xc1   :  { %v888_v57 = vshrl.u32 %v2515_v32, %v885_v29  ;;  %v891_v31 = vshrl.u32 %v2516_v34, %v885_v29  ;;  %v894_v20 = vshrl.u32 %v2517_v36, %v885_v29  ;;  %v899_v27 = vshll.u32 %v2518_v38, %v884_v39 }
  0xc2   :  { %v685_v41 = vsel %vm564_vm2, %v684_v19, %v683_v8  ;;  %v812_v10 = vadd.s32 1, %v808_v14  ;;  %v897_v25 = vshrl.u32 %v2518_v38, %v885_v29  ;;  %v900_v45 = vshrl.u32 %v2519_v47, %v885_v29 }
  0xc3   :  { %vm553_vm0 = vcmp.lt.s32.totalorder %v3073_v55, 2  ;;  %v555_v56 = vxor.u32 2147483648, %v3108_v23  ;;  %v688_v32 = vsel %vm3089_vm5, %v2776_v24, %v685_v41  ;;  %v878_v34 = vor.u32 8388608, %v877_v4 }
  0xc4   :  { %v889_v36 = vor.u32 %v888_v57, %v887_v26  ;;  %v690_v43 = vmul.f32 %v688_v32, %v688_v32  ;;  %v813_v52 = vsel %vm811_vm13, %v812_v10, %v808_v14  ;;  %v892_v9 = vor.u32 %v891_v31, %v890_v21 }
  0xc5   :  { %v898_v35 = vor.u32 %v897_v25, %v896_v46  ;;  %v814_v38 = vadd.s32 %v813_v52, %v809_v49  ;;  %v895_v22 = vor.u32 %v894_v20, %v893_v63  ;;  %v901_v47 = vor.u32 %v900_v45, %v899_v27 }
  0xc6   :  { %vm902_vm1 = vcmp.lt.s32.totalorder %v3119_v51, 1  ;;  %v691_v17 = vmul.f32 -0.001358992, %v690_v43  ;;  %v698_v12 = vmul.f32 -0.00019511016, %v690_v43  ;;  %vm904_vm15 = vcmp.lt.s32.totalorder %v3119_v51, 3 }
  0xc7   :  { %vm905_vm2 = vcmp.lt.s32.totalorder %v3119_v51, 4  ;;  %v556_v16 = vsel %vm554_vm10, %v3077_v2, %v555_v56  ;;  %v559_v49 = vsel %vm557_vm12, %v558_v37, %v3108_v23  ;;  %v815_v58 = vadd.s32 536870912, %v814_v38 }
  0xc8   :  { %v911_v7 = vsel %vm905_vm2, %v898_v35, 920167782  ;;  %v692_v11 = vadd.f32 0.041655596, %v691_v17  ;;  %v699_v39 = vadd.f32 0.008332121, %v698_v12  ;;  %v910_v4 = vsel %vm902_vm1, %v889_v36, %v892_v9 }
  0xc9   :  { %vm903_vm3 = vcmp.lt.s32.totalorder %v3119_v51, 2  ;;  %v3157_v8 = vshll.u32 %v878_v34, 8  ;;  %v816_v54 = vshrl.u32 %v815_v58, 30  ;;  %v912_v26 = vsel %vm904_vm15, %v895_v22, %v911_v7 }
  0xca   :  { %v914_v21 = vsel %vm902_vm1, %v892_v9, %v895_v22  ;;  %v693_v19 = vmul.f32 %v692_v11, %v690_v43  ;;  %v700_v14 = vmul.f32 %v699_v39, %v690_v43  ;;  %v886_v63 = vshrl.u32 %v2514_v30, %v885_v29 }
  0xcb   :  { %v915_v46 = vsel %vm905_vm2, %v901_v47, 1326507024  ;;  %v3169_v57 = vand.u32 3, %v3113_v61  ;;  %v817_v31 = vshll.u32 %v816_v54, 30  ;;  %v920_v27 = vshrl.u32 %v3157_v8, 16 }
  0xcc   :  { %v916_v20 = vsel %vm904_vm15, %v898_v35, %v915_v46  ;;  %v694_v41 = vadd.f32 -0.4999988, %v693_v19  ;;  %v701_v10 = vadd.f32 -0.16666654, %v700_v14  ;;  %v913_v25 = vsel %vm903_vm3, %v910_v4, %v912_v26 }
  0xcd   :  { %v917_v30 = vsel %vm903_vm3, %v914_v21, %v916_v20  ;;  %vm718_vm4 = vcmp.lt.s32.totalorder %v2846_v33, 0  ;;  %v3179_v29 = vsub.s32 %v814_v38, %v817_v31  ;;  %v907_v45 = vsel %vm905_vm2, %v895_v22, 2102212464 }
  0xce   :  { %v919_v34 = vand.u32 65535, %v3157_v8  ;;  %v921_v52 = vand.u32 65535, %v917_v30  ;;  %v3186_v35 = vsel %vm553_vm0, %v556_v16, %v559_v49  ;;  %v695_v47 = vmul.f32 %v694_v41, %v690_v43 }
  0xcf   :  { %v702_v17 = vmul.f32 %v701_v10, %v690_v43  ;;  %v906_v12 = vsel %vm902_vm1, %v886_v63, %v889_v36  ;;  %vm819_vm5 = vcmp.lt.s32.totalorder %v3179_v29, 0  ;;  %v820_v38 = vsub.s32 0, %v3179_v29 }
  0xd0   :  { %v922_v58 = vshrl.u32 %v917_v30, 16  ;;  %v944_v7 = vshrl.u32 %v913_v25, 16  ;;  %vm708_vm6 = vcmp.eq.s32.totalorder %v3169_v57, 0  ;;  %v908_v22 = vsel %vm904_vm15, %v892_v9, %v907_v45 }
  0xd1   :  { %v703_v11 = vadd.f32 1.0, %v702_v17  ;;  %v3195_v55 = vmul.u32 %v921_v52, %v920_v27  ;;  %v943_v16 = vand.u32 65535, %v913_v25  ;;  %v3197_v49 = vadd.f32 1.0, %v695_v47 }
  0xd2   :  { %v821_v43 = vsel %vm819_vm5, %v820_v38, %v3179_v29  ;;  %v923_v36 = vmul.u32 %v921_v52, %v919_v34  ;;  %v924_v39 = vmul.u32 %v922_v58, %v919_v34  ;;  %vm711_vm7 = vcmp.eq.s32.totalorder %v3169_v57, 2 }
  0xd3   :  { %v3200_v4 = vmul.f32 %v703_v11, %v688_v32  ;;  %v822_v26 = vclz %v821_v43  ;;  %v840_v21 = vsub.s32 4, %v816_v54  ;;  %v810_v19 = vadd.s32 %v3098_v40, %v3100_v0 }
  0xd4   :  { %v927_v14 = vshll.u32 %v924_v39, 16  ;;  %v929_v9 = vshll.u32 %v3195_v55, 16  ;;  %v946_v63 = vmul.u32 %v944_v7, %v919_v34  ;;  %v3208_v31 = vsel %vm903_vm3, %v906_v12, %v908_v22 }
  0xd5   :  { %v2409_v46 = vadd.s32 4294967294, %v822_v26  ;;  %v926_v20 = vmul.u32 %v922_v58, %v920_v27  ;;  %v945_v41 = vmul.u32 %v943_v16, %v919_v34  ;;  %v712_v32 = vxor.u32 2147483648, %v3197_v49 }
  0xd6   :  { %vm931_vm8 = vc.u32 %v923_v36, %v927_v14  ;;  %v933_v10 = vadd.s32 %v927_v14, %v923_v36  ;;  %v947_v25 = vmul.u32 %v943_v16, %v920_v27  ;;  %vm707_vm9 = vcmp.lt.s32.totalorder %v3169_v57, 2 }
  0xd7   :  { %v709_v40 = vxor.u32 2147483648, %v3200_v4  ;;  %vm2410_vm10 = vcmp.lt.s32.totalorder %v2409_v46, 0  ;;  %v841_v0 = vsel %vm718_vm4, %v840_v21, %v816_v54  ;;  %v928_v30 = vshrl.u32 %v924_v39, 16 }
  0xd8   :  { %v825_v45 = vsel %vm2410_vm10, 0, %v2409_v46  ;;  %v932_v51 = vsel %vm931_vm8, 1, %v2520_v48  ;;  %vm935_vm12 = vc.u32 %v933_v10, %v929_v9  ;;  %v949_v52 = vshll.u32 %v946_v63, 16 }
  0xd9   :  { %vm3218_vm13 = vcmp.le.f32.partialorder %v716_v18, 0.7853982  ;;  %v826_v47 = vsub.s32 32, %v825_v45  ;;  %v827_v17 = vshll.u32 %v3179_v29, %v825_v45  ;;  %v830_v12 = vsub.s32 4294967266, %v825_v45 }
  0xda   :  { %v930_v38 = vshrl.u32 %v3195_v55, 16  ;;  %v713_v54 = vsel %vm711_vm7, %v712_v32, %v3200_v4  ;;  %v934_v58 = vadd.s32 %v932_v51, %v926_v20  ;;  %v948_v11 = vmul.u32 %v944_v7, %v920_v27 }
  0xdb   :  { %v951_v22 = vshll.u32 %v947_v25, 16  ;;  %v828_v16 = vshrl.u32 %v810_v19, %v826_v47  ;;  %v831_v18 = vadd.s32 127, %v830_v12  ;;  %v936_v43 = vsel %vm935_vm12, 1, %v2520_v48 }
  0xdc   :  { %v950_v36 = vshrl.u32 %v946_v63, 16  ;;  %v710_v29 = vsel %vm708_vm6, %v3197_v49, %v709_v40  ;;  %v938_v55 = vadd.s32 %v936_v43, %v934_v58  ;;  %vm953_vm0 = vc.u32 %v945_v41, %v949_v52 }
  0xdd   :  { %v955_v39 = vadd.s32 %v949_v52, %v945_v41  ;;  %vm551_vm1 = vweird.f32 %v2555_v13  ;;  %v829_v26 = vor.u32 %v828_v16, %v827_v17  ;;  %v832_v21 = vshll.u32 %v831_v18, 23 }
  0xde   :  { %v954_v27 = vsel %vm953_vm0, 1, %v2520_v48  ;;  %v1168_v7 = vadd.s32 3, %v2821_v53  ;;  %v939_v19 = vadd.s32 %v938_v55, %v928_v30  ;;  %v952_v14 = vshrl.u32 %v947_v25, 16 }
  0xdf   :  { %v956_v9 = vadd.s32 %v954_v27, %v948_v11  ;;  %vm957_vm15 = vc.u32 %v955_v39, %v951_v22  ;;  %vm705_vm2 = vweird.f32 %v2776_v24  ;;  %v833_v63 = vor.u32 4788187, %v832_v21 }
  0xe0   :  { %v836_v46 = vcvt.s32.f32 %v829_v26  ;;  %v958_v20 = vsel %vm957_vm15, 1, %v2520_v48  ;;  %v1169_v41 = vand.u32 3, %v1168_v7  ;;  %v940_v10 = vadd.s32 %v939_v19, %v930_v38 }
  0xe1   :  { %v959_v45 = vadd.s32 %v955_v39, %v951_v22  ;;  %v960_v51 = vadd.s32 %v958_v20, %v956_v9  ;;  %v1323_v53 = vadd.s32 3, %v2856_v1  ;;  %v834_v52 = vand.u32 2147483647, %v833_v63 }
  0xe2   :  { %vm1170_vm3 = vcmp.lt.s32.totalorder %v1169_v41, 2  ;;  %vm1171_vm5 = vcmp.eq.s32.totalorder %v1169_v41, 0  ;;  %vm1174_vm6 = vcmp.eq.s32.totalorder %v1169_v41, 2  ;;  %v714_v25 = vsel %vm707_vm9, %v710_v29, %v713_v54 }
  0xe3   :  { %v3249_v30 = vsel %vm3218_vm13, 0, %v841_v0  ;;  %v961_v47 = vadd.s32 %v960_v51, %v950_v36  ;;  %v3834_v48 = vxor.u32 2147483648, %v2852_v62  ;;  %v837_v12 = vmul.f32 %v836_v46, %v834_v52 }
  0xe4   :  { %v3835_v1 = vxor.u32 2147483648, %v2841_v50  ;;  %v1324_v58 = vand.u32 3, %v1323_v53  ;;  %v1478_v11 = vadd.s32 3, %v3049_v42  ;;  %v963_v0 = vmul.u32 %v3157_v8, %v3208_v31 }
  0xe5   :  { %v1173_v17 = vsel %vm1171_vm5, %v2841_v50, %v3834_v48  ;;  %v962_v57 = vadd.s32 %v961_v47, %v952_v14  ;;  %vm965_vm7 = vc.u32 %v940_v10, %v959_v45  ;;  %v838_v22 = vxor.u32 2147483648, %v837_v12 }
  0xe6   :  { %v1176_v38 = vsel %vm1174_vm6, %v3835_v1, %v2852_v62  ;;  %vm1325_vm8 = vcmp.lt.s32.totalorder %v1324_v58, 2  ;;  %vm1326_vm9 = vcmp.eq.s32.totalorder %v1324_v58, 0  ;;  %v3836_v62 = vxor.u32 2147483648, %v2944_v28 }
  0xe7   :  { %v1177_v54 = vsel %vm1170_vm3, %v1173_v17, %v1176_v38  ;;  %v966_v50 = vadd.s32 1, %v962_v57  ;;  %vm1329_vm10 = vcmp.eq.s32.totalorder %v1324_v58, 2  ;;  %v1479_v18 = vand.u32 3, %v1478_v11 }
  0xe8   :  { %v3262_v16 = vsel %vm243_vm14, nan, %v1177_v54  ;;  %v1328_v42 = vsel %vm1326_vm9, %v2922_v60, %v3836_v62  ;;  %v839_v43 = vsel %vm718_vm4, %v838_v22, %v837_v12  ;;  %v3837_v8 = vxor.u32 2147483648, %v2922_v60 }
  0xe9   :  { %v3273_v3 = vsub.f32 0.0, %v3262_v16  ;;  %v1958_v36 = vstv %s3238_s24  ;;  %v3280_v29 = vsel %vm551_vm1, nan, %v3186_v35  ;;  %v3285_v55 = vsel %vm3218_vm13, %v2846_v33, %v839_v43  ;;  %s2066_s24 = smul.f32 %s3396_s5, %s3494_s17 }
  0xea   :  { %v1331_v31 = vsel %vm1329_vm10, %v3837_v8, %v2944_v28  ;;  %v3288_v60 = vand.u32 3, %v3249_v30  ;;  %v967_v28 = vsel %vm965_vm7, %v966_v50, %v962_v57  ;;  %v844_v39 = vmul.f32 %v3285_v55, %v3285_v55 }
  0xeb   :  { %v968_v26 = vadd.s32 %v967_v28, %v963_v0  ;;  %v1332_v21 = vsel %vm1325_vm8, %v1328_v42, %v1331_v31  ;;  %vm1481_vm14 = vcmp.eq.s32.totalorder %v1479_v18, 0  ;;  %v3296_v35 = vsel %vm705_vm2, nan, %v714_v25 }
  0xec   :  { %vm1484_vm4 = vcmp.eq.s32.totalorder %v1479_v18, 2  ;;  %v1633_v34 = vadd.s32 3, %v3113_v61  ;;  %v1959_v27 = vmul.f32 %v1958_v36, %v3273_v3  ;;  %v845_v7 = vmul.f32 -0.001358992, %v844_v39 }
  0xed   :  { %v852_v19 = vmul.f32 -0.00019511016, %v844_v39  ;;  %v969_v14 = vadd.s32 536870912, %v968_v26  ;;  %v3304_v9 = vstv %s1960_s26  ;;  %vm872_vm12 = vcmp.lt.s32.totalorder %v2848_v59, 0  ;;  %s2073_s26 = smul.f32 %s3456_s13, %s3494_s17  ;;  %s3751_s17 = sld [smem:[#allocation2 + $0x1e]] }
  0xee   :  { %v3309_v63 = vsel %vm397_vm11, nan, %v1332_v21  ;;  %vm1480_vm13 = vcmp.lt.s32.totalorder %v1479_v18, 2  ;;  %v1483_v61 = vsel %vm1481_vm14, %v3077_v2, %v555_v56  ;;  %v1634_v46 = vand.u32 3, %v1633_v34 }
  0xef   :  { %v846_v20 = vadd.f32 0.041655596, %v845_v7  ;;  %v853_v41 = vadd.f32 0.008332121, %v852_v19  ;;  %v970_v51 = vshrl.u32 %v969_v14, 30  ;;  %v1486_v53 = vsel %vm1484_vm4, %v558_v37, %v3108_v23 }
  0xf0   :  { %vm865_vm0 = vcmp.eq.s32.totalorder %v3288_v60, 2  ;;  %v3318_v52 = vadd.s32 %v959_v45, %v940_v10  ;;  %vm1636_vm15 = vcmp.eq.s32.totalorder %v1634_v46, 0  ;;  %v1962_v5 = vadd.f32 %v3304_v9, %v1959_v27 }
  0xf1   :  { %v1970_v25 = vstv %s3240_s25  ;;  %v847_v47 = vmul.f32 %v846_v20, %v844_v39  ;;  %v854_v48 = vmul.f32 %v853_v41, %v844_v39  ;;  %vm3324_vm11 = vcmp.le.f32.partialorder %v870_v44, 0.7853982  ;;  %s3559_s25 = sadd.f32 %s2010_s1, %s3481_s16 }
  0xf2   :  { %v971_v17 = vshll.u32 %v970_v51, 30  ;;  %vm1639_vm3 = vcmp.eq.s32.totalorder %v1634_v46, 2  ;;  %vm862_vm5 = vcmp.eq.s32.totalorder %v3288_v60, 0  ;;  %v1487_v2 = vsel %vm1480_vm13, %v1483_v61, %v1486_v53  ;;  %s3766_s1 = sld [smem:[#allocation2 + $0x20]] }
  0xf3   :  { %v1963_v23 = vmul.f32 %v3057_v6, %v3045_v15  ;;  %v1964_v37 = vmul.f32 %v1962_v5, %v3309_v63  ;;  %v1967_v10 = vmul.f32 %v3309_v63, %v3045_v15  ;;  %v848_v45 = vadd.f32 -0.4999988, %v847_v47 }
  0xf4   :  { %v855_v12 = vadd.f32 -0.16666654, %v854_v48  ;;  %vm861_vm6 = vcmp.lt.s32.totalorder %v3288_v60, 2  ;;  %v3336_v44 = vsub.s32 %v968_v26, %v971_v17  ;;  %v994_v1 = vsub.s32 4, %v970_v51 }
  0xf5   :  { %vm1635_vm7 = vcmp.lt.s32.totalorder %v1634_v46, 2  ;;  %v1638_v38 = vsel %vm1636_vm15, %v3197_v49, %v709_v40  ;;  %v1641_v58 = vsel %vm1639_vm3, %v712_v32, %v3200_v4  ;;  %v1788_v11 = vadd.s32 3, %v3249_v30 }
  0xf6   :  { %v849_v57 = vmul.f32 %v848_v45, %v844_v39  ;;  %v856_v0 = vmul.f32 %v855_v12, %v844_v39  ;;  %vm973_vm8 = vcmp.lt.s32.totalorder %v3336_v44, 0  ;;  %v974_v54 = vsub.s32 0, %v3336_v44 }
  0xf7   :  { %vm859_vm9 = vweird.f32 %v2846_v33  ;;  %v3353_v40 = vsel %vm551_vm1, nan, %v1487_v2  ;;  %v1789_v49 = vand.u32 3, %v1788_v11  ;;  %v3355_v22 = vadd.f32 %v1964_v37, %v1963_v23 }
  0xf8   :  { %v1966_v4 = vmul.f32 %v1962_v5, %v3057_v6  ;;  %v850_v32 = vadd.f32 1.0, %v849_v57  ;;  %v857_v30 = vadd.f32 1.0, %v856_v0  ;;  %v975_v50 = vsel %vm973_vm8, %v974_v54, %v3336_v44 }
  0xf9   :  { %v995_v62 = vsel %vm872_vm12, %v994_v1, %v970_v51  ;;  %v976_v42 = vclz %v975_v50  ;;  %v1642_v18 = vsel %vm1635_vm7, %v1638_v38, %v1641_v58  ;;  %v1971_v13 = vmul.f32 %v1970_v25, %v3273_v3 }
  0xfa   :  { %v1983_v43 = vmul.f32 %v1958_v36, %v3045_v15  ;;  %v858_v8 = vmul.f32 %v857_v30, %v3285_v55  ;;  %v866_v31 = vxor.u32 2147483648, %v850_v32  ;;  %vm1794_vm1 = vcmp.eq.s32.totalorder %v1789_v49, 2 }
  0xfb   :  { %v1972_v28 = vstv %s1969_s28  ;;  %v2412_v39 = vadd.s32 4294967294, %v976_v42  ;;  %v997_v26 = vsel %vm3324_vm11, 0, %v995_v62  ;;  %vm1791_vm10 = vcmp.eq.s32.totalorder %v1789_v49, 0  ;;  %s2078_s28 = ssub.f32 0.0, %s3517_s20 }
  0xfc   :  { %v3376_v21 = vsub.f32 %v1966_v4, %v1967_v10  ;;  %v863_v34 = vxor.u32 2147483648, %v858_v8  ;;  %v867_v36 = vsel %vm865_vm0, %v866_v31, %v858_v8  ;;  %v3384_v55 = vsel %vm705_vm2, nan, %v1642_v18  ;;  %s3761_s20 = sld [smem:[#allocation2 + $0x21]] }
  0xfd   :  { %vm1790_vm14 = vcmp.lt.s32.totalorder %v1789_v49, 2  ;;  %vm2413_vm4 = vcmp.lt.s32.totalorder %v2412_v39, 0  ;;  %v1796_v27 = vsel %vm1794_vm1, %v866_v31, %v858_v8  ;;  %v3391_v7 = vsub.f32 %v1972_v28, %v1971_v13  ;;  %s2079_s29 = smul.f32 %s3542_s23, %s2078_s28 }
  0xfe   :  { %v1984_v19 = vadd.f32 %v1983_v43, %v3304_v9  ;;  %v864_v14 = vsel %vm862_vm5, %v850_v32, %v863_v34  ;;  %v979_v61 = vsel %vm2413_vm4, 0, %v2412_v39  ;;  %v1793_v46 = vsel %vm1791_vm10, %v850_v32, %v863_v34 }
  0xff   :  { %v1943_v24 = vadd.s32 3, %v997_v26  ;;  %v868_v20 = vsel %vm861_vm6, %v864_v14, %v867_v36  ;;  %v980_v41 = vsub.s32 32, %v979_v61  ;;  %v981_v51 = vshll.u32 %v3336_v44, %v979_v61 }
 0x100   :  { %v984_v53 = vsub.s32 4294967266, %v979_v61  ;;  %v1985_v9 = vmul.f32 %v3262_v16, %v3057_v6  ;;  %v1986_v5 = vmul.f32 %v1984_v19, %v3309_v63  ;;  %v1989_v47 = vmul.f32 %v3309_v63, %v3262_v16 }
 0x101   :  { %v1991_v60 = vmul.f32 %v1970_v25, %v3045_v15  ;;  %v982_v48 = vshrl.u32 %v3318_v52, %v980_v41  ;;  %v3413_v2 = vand.u32 3, %v997_v26  ;;  %v1797_v23 = vsel %vm1790_vm14, %v1793_v46, %v1796_v27 }
 0x102   :  { %v985_v17 = vadd.s32 127, %v984_v53  ;;  %v3421_v37 = vsel %vm859_vm9, nan, %v868_v20  ;;  %v3425_v25 = vsel %vm859_vm9, nan, %v1797_v23  ;;  %v3427_v10 = vand.u32 3, %v1943_v24 }
 0x103   :  { %v1974_v45 = vstv %s3378_s30  ;;  %v983_v52 = vor.u32 %v982_v48, %v981_v51  ;;  %v1976_v1 = vstv %s3417_s8  ;;  %v1980_v33 = vstv %s1979_s6  ;;  %s3617_s30 = sld [smem:[#allocation2 + $0x4]] }
 0x104   :  { %v986_v12 = vshll.u32 %v985_v17, 23  ;;  %v1975_v44 = vmul.f32 %v1974_v45, %v3045_v15  ;;  %v1977_v38 = vmul.f32 %v1976_v1, %v3273_v3  ;;  %v3439_v58 = vadd.f32 %v1986_v5, %v1985_v9  ;;  %s3665_s6 = sld [smem:[#allocation2 + $0x9]] }
 0x105   :  { %v1988_v11 = vmul.f32 %v1984_v19, %v3057_v6  ;;  %v990_v0 = vcvt.s32.f32 %v983_v52  ;;  %v3442_v54 = vsub.f32 %v1972_v28, %v1991_v60  ;;  %v1993_v49 = vmul.f32 %v1974_v45, %v3262_v16 }
 0x106   :  { %v987_v57 = vor.u32 4788187, %v986_v12  ;;  %v1978_v4 = vadd.f32 %v1977_v38, %v1975_v44  ;;  %v1994_v3 = vmul.f32 %v1976_v1, %v3045_v15  ;;  %v1999_v30 = vmul.f32 0.0, %v3057_v6 }
 0x107   :  { %v1990_v32 = vsub.f32 %v1988_v11, %v1989_v47  ;;  %v2000_v62 = vstv %s1998_s9  ;;  %v2004_v42 = vmul.f32 0.0, %v3309_v63  ;;  %v3450_v18 = vstv %s3396_s5  ;;  %s3659_s5 = sld [smem:[#allocation2 + $0x15]] }
 0x108   :  { %v988_v50 = vand.u32 2147483647, %v987_v57  ;;  %v1981_v13 = vadd.f32 %v1980_v33, %v1978_v4  ;;  %v1995_v43 = vadd.f32 %v1994_v3, %v1993_v49  ;;  %v2001_v16 = vmul.f32 %v2000_v62, %v3309_v63 }
 0x109   :  { %v2003_v8 = vmul.f32 %v2000_v62, %v3057_v6  ;;  %v2016_v15 = vmul.f32 %v3450_v18, %v3376_v21  ;;  %v3462_v28 = vstv %s3410_s7  ;;  %v2020_v39 = vmul.f32 %v3355_v22, %v3280_v29  ;;  %s2140_s7 = ssub.f32 0.0, %s3617_s30  ;;  %s2142_s8 = smul.f32 %s3646_s4, %s3617_s30 }
 0x10a   :  { %v991_v31 = vmul.f32 %v990_v0, %v988_v50  ;;  %v3466_v26 = vadd.f32 %v1995_v43, %v1980_v33  ;;  %v3468_v63 = vadd.f32 %v2001_v16, %v1999_v30  ;;  %v2018_v34 = vmul.f32 %v3462_v28, %v3391_v7  ;;  %s2347_s30 = sshll.u32 %s3819_s2, 4  ;;  %s2348_s30 = int_to_ptr.hbm [resolvable:$true] %s2347_s30 }
 0x10b   :  { %v3470_v6 = vsub.f32 %v2003_v8, %v2004_v42  ;;  %v2024_v27 = vmul.f32 %v3355_v22, %v3353_v40  ;;  %v2026_v19 = vmul.f32 %v3450_v18, %v3391_v7  ;;  %v2027_v14 = vmul.f32 %v3462_v28, %v3376_v21 }
 0x10c   :  { %v992_v36 = vxor.u32 2147483648, %v991_v31  ;;  %v2019_v61 = vadd.f32 %v2018_v34, %v2016_v15  ;;  %v3484_v46 = vstv %s3436_s11  ;;  %v3486_v24 = vstv %s2013_s12  ;;  %s3709_s11 = sld [smem:[#allocation2 + $0x10]] }
 0x10d   :  { %v2034_v20 = vstv %s3456_s13  ;;  %v3496_v51 = vsub.f32 %v2026_v19, %v2027_v14  ;;  %v2030_v53 = vmul.f32 %v3484_v46, %v3355_v22  ;;  %v2032_v9 = vmul.f32 %v3486_v24, %v3376_v21  ;;  %s2141_s9 = smul.f32 %s3659_s5, %s2140_s7  ;;  %s3719_s12 = sld [smem:[#allocation2 + $0x16]] }
 0x10e   :  { %v993_v41 = vsel %vm872_vm12, %v992_v36, %v991_v31  ;;  %v2021_v47 = vmul.f32 %v2019_v61, %v3353_v40  ;;  %v2023_v60 = vmul.f32 %v2019_v61, %v3280_v29  ;;  %v2035_v48 = vmul.f32 %v2034_v20, %v3391_v7  ;;  %s3722_s13 = sld [smem:[#allocation2 + $0xa]] }
 0x10f   :  { %v3505_v5 = vsel %vm3324_vm11, %v2848_v59, %v993_v41  ;;  %v2033_v17 = vadd.f32 %v2032_v9, %v2030_v53  ;;  %v2038_v21 = vmul.f32 %v3450_v18, %v1990_v32  ;;  %v2039_v56 = vmul.f32 %v3462_v28, %v3442_v54 }
 0x110   :  { %v998_v22 = vmul.f32 %v3505_v5, %v3505_v5  ;;  %v3519_v23 = vadd.f32 %v2021_v47, %v2020_v39  ;;  %v3521_v45 = vsub.f32 %v2023_v60, %v2024_v27  ;;  %v2041_v7 = vmul.f32 %v3439_v58, %v3280_v29 }
 0x111   :  { %v2045_v52 = vmul.f32 %v3439_v58, %v3353_v40  ;;  %v2036_v1 = vadd.f32 %v2035_v48, %v2033_v17  ;;  %v2040_v38 = vadd.f32 %v2039_v56, %v2038_v21  ;;  %v2047_v33 = vmul.f32 %v3450_v18, %v3442_v54 }
 0x112   :  { %v999_v12 = vmul.f32 -0.001358992, %v998_v22  ;;  %v1006_v44 = vmul.f32 -0.00019511016, %v998_v22  ;;  %v2048_v11 = vmul.f32 %v3462_v28, %v1990_v32  ;;  %v2050_v57 = vmul.f32 %v3484_v46, %v3439_v58  ;;  %s2204_s15 = smul.f32 %s3709_s11, %s3701_s10 }
 0x113   :  { %v2051_v0 = vmul.f32 %v3486_v24, %v1990_v32  ;;  %v3539_v3 = vadd.f32 %v2036_v1, %v1981_v13  ;;  %v2042_v30 = vmul.f32 %v2040_v38, %v3353_v40  ;;  %vm1019_vm2 = vcmp.eq.s32.totalorder %v3413_v2, 2  ;;  %s2203_s16 = smul.f32 %s3719_s12, %s2202_s14 }
 0x114   :  { %v1000_v49 = vadd.f32 0.041655596, %v999_v12  ;;  %v1007_v4 = vadd.f32 0.008332121, %v1006_v44  ;;  %vm1949_vm12 = vcmp.eq.s32.totalorder %v3427_v10, 2  ;;  %v2044_v58 = vmul.f32 %v2040_v38, %v3280_v29 }
 0x115   :  { %v3547_v32 = vsub.f32 %v2047_v33, %v2048_v11  ;;  %v2052_v50 = vadd.f32 %v2051_v0, %v2050_v57  ;;  %v2053_v62 = vmul.f32 %v2034_v20, %v3442_v54  ;;  %v3552_v43 = vadd.f32 %v2042_v30, %v2041_v7 }
 0x116   :  { %v1001_v42 = vmul.f32 %v1000_v49, %v998_v22  ;;  %v1008_v13 = vmul.f32 %v1007_v4, %v998_v22  ;;  %v2056_v16 = vmul.f32 %v3450_v18, %v3470_v6  ;;  %vm1016_vm13 = vcmp.eq.s32.totalorder %v3413_v2, 0 }
 0x117   :  { %vm1946_vm0 = vcmp.eq.s32.totalorder %v3427_v10, 0  ;;  %v3561_v8 = vsub.f32 %v2044_v58, %v2045_v52  ;;  %v2054_v31 = vadd.f32 %v2053_v62, %v2052_v50  ;;  %v2058_v15 = vstv %s2057_s21  ;;  %s3771_s21 = sld [smem:[#allocation2 + $0x24]] }
 0x118   :  { %v2060_v54 = vmul.f32 %v3468_v63, %v3280_v29  ;;  %v1002_v39 = vadd.f32 -0.4999988, %v1001_v42  ;;  %v1009_v34 = vadd.f32 -0.16666654, %v1008_v13  ;;  %vm1015_vm15 = vcmp.lt.s32.totalorder %v3413_v2, 2 }
 0x119   :  { %vm1945_vm11 = vcmp.lt.s32.totalorder %v3427_v10, 2  ;;  %v2059_v18 = vadd.f32 %v2058_v15, %v2056_v16  ;;  %v2064_v36 = vmul.f32 %v3468_v63, %v3353_v40  ;;  %vm1013_vm3 = vweird.f32 %v2848_v59 }
 0x11a   :  { %v3575_v27 = vadd.f32 %v2054_v31, %v3466_v26  ;;  %v2067_v19 = vmul.f32 %v3462_v28, %v3470_v6  ;;  %v2068_v14 = vstv %s2066_s24  ;;  %v2070_v61 = vmul.f32 %v3484_v46, %v3468_v63  ;;  %s3782_s24 = sld [smem:[#allocation2 + $0x25]] }
 0x11b   :  { %v1003_v20 = vmul.f32 %v1002_v39, %v998_v22  ;;  %v1010_v41 = vmul.f32 %v1009_v34, %v998_v22  ;;  %v2061_v53 = vmul.f32 %v2059_v18, %v3353_v40  ;;  %v2063_v9 = vmul.f32 %v2059_v18, %v3280_v29 }
 0x11c   :  { %v3584_v47 = vsub.f32 %v2068_v14, %v2067_v19  ;;  %v2071_v26 = vmul.f32 %v3486_v24, %v3470_v6  ;;  %v2074_v28 = vstv %s2073_s26  ;;  %v2076_v60 = vstv %s3559_s25  ;;  %s3789_s25 = sld [smem:[#allocation2 + $0x26]]  ;;  %s2521_s26 = smov [#allocation7]  }
 0x11d   :  { %v1004_v48 = vadd.f32 1.0, %v1003_v20  ;;  %v1011_v17 = vadd.f32 1.0, %v1010_v41  ;;  %v3589_v21 = vadd.f32 %v2061_v53, %v2060_v54  ;;  %v3591_v63 = vsub.f32 %v2063_v9, %v2064_v36 }
 0x11e   :  { %v2072_v46 = vadd.f32 %v2071_v26, %v2070_v61  ;;  %v3595_v22 = vstv %s3537_s22  ;;  %v3598_v40 = vstv %s3542_s23  ;;  %v2086_v29 = vmul.f32 %v3519_v23, %v3296_v35  ;;  %s3773_s22 = sld [smem:[#allocation2 + $0x22]] }
 0x11f   :  { %v1012_v6 = vmul.f32 %v1011_v17, %v3505_v5  ;;  %v1020_v24 = vxor.u32 2147483648, %v1004_v48  ;;  %v2082_v56 = vmul.f32 %v3595_v22, %v3521_v45  ;;  %v2084_v7 = vmul.f32 %v3598_v40, %v3496_v51  ;;  %s3776_s23 = sld [smem:[#allocation2 + $0x23]] }
 0x120   :  { %v2075_v52 = vadd.f32 %v2074_v28, %v2072_v46  ;;  %v2090_v12 = vmul.f32 %v3519_v23, %v3384_v55  ;;  %v2092_v44 = vmul.f32 %v3595_v22, %v3496_v51  ;;  %v2093_v1 = vmul.f32 %v3598_v40, %v3521_v45 }
 0x121   :  { %v1017_v38 = vxor.u32 2147483648, %v1012_v6  ;;  %v1021_v5 = vsel %vm1019_vm2, %v1020_v24, %v1012_v6  ;;  %v1951_v33 = vsel %vm1949_vm12, %v1020_v24, %v1012_v6  ;;  %v2085_v11 = vadd.f32 %v2084_v7, %v2082_v56 }
 0x122   :  { %v3619_v57 = vadd.f32 %v2076_v60, %v2075_v52  ;;  %v3623_v0 = vsub.f32 %v2092_v44, %v2093_v1  ;;  %v2095_v49 = vstv %s3567_s27  ;;  %v2097_v4 = vstv %s2079_s29  ;;  %s2345_s27 = sshll.u32 %s2521_s26, 4  ;;  %s2346_s27 = int_to_ptr.vmem [resolvable:$true] %s2345_s27 }
 0x123   :  { %v1018_v30 = vsel %vm1016_vm13, %v1004_v48, %v1017_v38  ;;  %v1948_v58 = vsel %vm1946_vm0, %v1004_v48, %v1017_v38  ;;  %v2087_v50 = vmul.f32 %v2085_v11, %v3384_v55  ;;  %v2089_v62 = vmul.f32 %v2085_v11, %v3296_v35 }
 0x124   :  { %v1022_v42 = vsel %vm1015_vm15, %v1018_v30, %v1021_v5  ;;  %v1952_v13 = vsel %vm1945_vm11, %v1948_v58, %v1951_v33  ;;  %v2096_v16 = vmul.f32 %v2095_v49, %v3519_v23  ;;  %v2098_v31 = vmul.f32 %v2097_v4, %v3521_v45 }
 0x125   :  { %v3640_v15 = vsel %vm1013_vm3, nan, %v1022_v42  ;;  %v3644_v54 = vsel %vm1013_vm3, nan, %v1952_v13  ;;  %v2088_v39 = vadd.f32 %v2087_v50, %v2086_v29  ;;  %v2091_v34 = vsub.f32 %v2089_v62, %v2090_v12 }
 0x126   :  { %v2099_v2 = vadd.f32 %v2098_v31, %v2096_v16  ;;  %v2100_v18 = vstv %s2080_s3  ;;  %v2104_v10 = vmul.f32 %v3595_v22, %v3561_v8  ;;  %v2105_v23 = vmul.f32 %v3598_v40, %v3547_v32 }
 0x127   :  { %v2101_v45 = vmul.f32 %v2100_v18, %v3496_v51  ;;  %v2107_v36 = vmul.f32 %v3552_v43, %v3296_v35  ;;  %v2111_v59 = vmul.f32 %v3552_v43, %v3384_v55  ;;  %v2113_v19 = vmul.f32 %v3595_v22, %v3547_v32 }
 0x128   :  { %v2106_v14 = vadd.f32 %v2105_v23, %v2104_v10  ;;  %v2114_v61 = vmul.f32 %v3598_v40, %v3561_v8  ;;  %v2116_v20 = vmul.f32 %v2095_v49, %v3552_v43  ;;  %v2117_v51 = vmul.f32 %v2097_v4, %v3561_v8 }
 0x129   :  { %v2102_v41 = vadd.f32 %v2101_v45, %v2099_v2  ;;  %v2119_v53 = vmul.f32 %v2100_v18, %v3547_v32  ;;  %v2122_v9 = vmul.f32 %v3595_v22, %v3591_v63  ;;  %v2123_v26 = vmul.f32 %v3598_v40, %v3584_v47 }
 0x12a   :  { %v2108_v28 = vmul.f32 %v2106_v14, %v3384_v55  ;;  %v2110_v60 = vmul.f32 %v2106_v14, %v3296_v35  ;;  %v3674_v43 = vsub.f32 %v2113_v19, %v2114_v61  ;;  %v2118_v8 = vadd.f32 %v2117_v51, %v2116_v20 }
 0x12b   :  { %v2103_v48 = vadd.f32 %v2102_v41, %v3539_v3  ;;  %v2124_v32 = vadd.f32 %v2123_v26, %v2122_v9  ;;  %v2125_v17 = vmul.f32 %v3589_v21, %v3296_v35  ;;  %v2129_v46 = vmul.f32 %v3589_v21, %v3384_v55 }
 0x12c   :  { %v2109_v29 = vadd.f32 %v2108_v28, %v2107_v36  ;;  %v2112_v6 = vsub.f32 %v2110_v60, %v2111_v59  ;;  %v2120_v24 = vadd.f32 %v2119_v53, %v2118_v8  ;;  %v2131_v56 = vmul.f32 %v3595_v22, %v3584_v47 }
 0x12d   :  { %v2126_v7 = vmul.f32 %v2124_v32, %v3384_v55  ;;  %v2128_v3 = vmul.f32 %v2124_v32, %v3296_v35  ;;  %v2132_v52 = vmul.f32 %v3598_v40, %v3591_v63  ;;  %v2134_v12 = vmul.f32 %v2095_v49, %v3589_v21 }
 0x12e   :  { %v3692_v44 = vadd.f32 %v2120_v24, %v3575_v27  ;;  %v2135_v1 = vmul.f32 %v2097_v4, %v3591_v63  ;;  %v2137_v38 = vmul.f32 %v2100_v18, %v3584_v47  ;;  %v2143_v22 = vstv %s3646_s4 }
 0x12f   :  { %v2127_v5 = vadd.f32 %v2126_v7, %v2125_v17  ;;  %v2130_v55 = vsub.f32 %v2128_v3, %v2129_v46  ;;  %v2133_v33 = vsub.f32 %v2131_v56, %v2132_v52  ;;  %v2144_v35 = vmul.f32 %v2143_v22, %v2091_v34 }
 0x130   :  { %v2136_v11 = vadd.f32 %v2135_v1, %v2134_v12  ;;  %v2145_v30 = vstv %s3659_s5  ;;  %v2148_v40 = vmul.f32 %v2088_v39, %v3421_v37  ;;  %v2152_v21 = vmul.f32 %v2088_v39, %v3425_v25 }
 0x131   :  { %v2146_v27 = vmul.f32 %v2145_v30, %v3623_v0  ;;  %v2154_v63 = vmul.f32 %v2143_v22, %v3623_v0  ;;  %v2155_v49 = vmul.f32 %v2145_v30, %v2091_v34  ;;  %v2157_v47 = vstv %s3665_s6 }
 0x132   :  { %v2138_v4 = vadd.f32 %v2137_v38, %v2136_v11  ;;  %v2158_v58 = vmul.f32 %v2157_v47, %v2088_v39  ;;  %v2159_v50 = vstv %s2141_s9  ;;  %v2162_v62 = vstv %s2142_s8 }
 0x133   :  { %v2147_v42 = vadd.f32 %v2146_v27, %v2144_v35  ;;  %v3706_v13 = vsub.f32 %v2154_v63, %v2155_v49  ;;  %v2160_v16 = vmul.f32 %v2159_v50, %v2091_v34  ;;  %v2163_v31 = vmul.f32 %v2162_v62, %v3623_v0 }
 0x134   :  { %v3712_v2 = vadd.f32 %v2138_v4, %v3619_v57  ;;  %v2166_v18 = vmul.f32 %v2143_v22, %v2112_v6  ;;  %v2167_v10 = vmul.f32 %v2145_v30, %v3674_v43  ;;  %v2169_v23 = vmul.f32 %v2109_v29, %v3421_v37 }
 0x135   :  { %v2149_v39 = vmul.f32 %v2147_v42, %v3425_v25  ;;  %v2151_v45 = vmul.f32 %v2147_v42, %v3421_v37  ;;  %v2161_v36 = vadd.f32 %v2160_v16, %v2158_v58  ;;  %v2173_v59 = vmul.f32 %v2109_v29, %v3425_v25 }
 0x136   :  { %v2168_v0 = vadd.f32 %v2167_v10, %v2166_v18  ;;  %v2175_v34 = vmul.f32 %v2143_v22, %v3674_v43  ;;  %v2176_v57 = vmul.f32 %v2145_v30, %v2112_v6  ;;  %v2178_v19 = vmul.f32 %v2157_v47, %v2109_v29 }
 0x137   :  { %v2150_v14 = vadd.f32 %v2149_v39, %v2148_v40  ;;  %v2153_v61 = vsub.f32 %v2151_v45, %v2152_v21  ;;  %v2164_v20 = vadd.f32 %v2163_v31, %v2161_v36  ;;  %v2179_v51 = vmul.f32 %v2159_v50, %v2112_v6 }
 0x138   :  { %v2170_v41 = vmul.f32 %v2168_v0, %v3425_v25  ;;  %v2172_v53 = vmul.f32 %v2168_v0, %v3421_v37  ;;  %v3726_v9 = vsub.f32 %v2175_v34, %v2176_v57  ;;  %v2181_v26 = vmul.f32 %v2162_v62, %v3674_v43 }
 0x139   :  { %v3729_v28 = vadd.f32 %v2164_v20, %v2103_v48  ;;  %v2180_v60 = vadd.f32 %v2179_v51, %v2178_v19  ;;  %v2184_v8 = vmul.f32 %v2143_v22, %v2130_v55  ;;  %v2185_v32 = vmul.f32 %v2145_v30, %v2133_v33 }
 0x13a   :  { %v2171_v17 = vadd.f32 %v2170_v41, %v2169_v23  ;;  %v2174_v46 = vsub.f32 %v2172_v53, %v2173_v59  ;;  %v2187_v29 = vmul.f32 %v2127_v5, %v3421_v37  ;;  %v2191_v6 = vmul.f32 %v2127_v5, %v3425_v25 }
 0x13b   :  { %v2182_v24 = vadd.f32 %v2181_v26, %v2180_v60  ;;  %v2186_v56 = vadd.f32 %v2185_v32, %v2184_v8  ;;  %v2193_v43 = vmul.f32 %v2143_v22, %v2133_v33  ;;  %v2194_v48 = vmul.f32 %v2145_v30, %v2130_v55 }
 0x13c   :  { %v2196_v7 = vmul.f32 %v2157_v47, %v2127_v5  ;;  %v2197_v3 = vmul.f32 %v2159_v50, %v2130_v55  ;;  %v2199_v52 = vmul.f32 %v2162_v62, %v2133_v33  ;;  %v2205_v12 = vstv %s3709_s11 }
 0x13d   :  { %v3738_v1 = vadd.f32 %v2182_v24, %v3692_v44  ;;  %v2188_v38 = vmul.f32 %v2186_v56, %v3425_v25  ;;  %v2190_v35 = vmul.f32 %v2186_v56, %v3421_v37  ;;  %v3742_v11 = vsub.f32 %v2193_v43, %v2194_v48 }
 0x13e   :  { %v2198_v40 = vadd.f32 %v2197_v3, %v2196_v7  ;;  %v2206_v21 = vmul.f32 %v2205_v12, %v2153_v61  ;;  %v2207_v22 = vstv %s3719_s12  ;;  %v2210_v5 = vmul.f32 %v2150_v14, %v3640_v15 }
 0x13f   :  { %v2189_v55 = vadd.f32 %v2188_v38, %v2187_v29  ;;  %v2192_v33 = vsub.f32 %v2190_v35, %v2191_v6  ;;  %v2208_v30 = vmul.f32 %v2207_v22, %v3706_v13  ;;  %v2214_v44 = vmul.f32 %v2150_v14, %v3644_v54 }
 0x140   :  { %v2200_v27 = vadd.f32 %v2199_v52, %v2198_v40  ;;  %v2216_v63 = vmul.f32 %v2205_v12, %v3706_v13  ;;  %v2217_v25 = vmul.f32 %v2207_v22, %v2153_v61  ;;  %v2219_v49 = vstv %s3722_s13 }
 0x141   :  { %v2209_v37 = vadd.f32 %v2208_v30, %v2206_v21  ;;  %v2220_v47 = vmul.f32 %v2219_v49, %v2150_v14  ;;  %v2221_v4 = vstv %s2203_s16  ;;  %v2224_v58 = vstv %s2204_s15 }
 0x142   :  { %v3756_v50 = vadd.f32 %v2200_v27, %v3712_v2  ;;  %v3758_v62 = vsub.f32 %v2216_v63, %v2217_v25  ;;  %v2222_v42 = vmul.f32 %v2221_v4, %v2153_v61  ;;  %v2225_v16 = vmul.f32 %v2224_v58, %v3706_v13 }
 0x143   :  { %v2211_v31 = vmul.f32 %v2209_v37, %v3644_v54  ;;  %v2213_v18 = vmul.f32 %v2209_v37, %v3640_v15  ;;  %v2228_v10 = vmul.f32 %v2205_v12, %v2174_v46  ;;  %v2229_v23 = vmul.f32 %v2207_v22, %v3726_v9 }
 0x144   :  { %v2223_v39 = vadd.f32 %v2222_v42, %v2220_v47  ;;  %v2231_v2 = vmul.f32 %v2171_v17, %v3640_v15  ;;  %v2235_v45 = vmul.f32 %v2171_v17, %v3644_v54  ;;  %v2237_v36 = vmul.f32 %v2205_v12, %v3726_v9 }
 0x145   :  { %v2212_v13 = vadd.f32 %v2211_v31, %v2210_v5  ;;  %v2215_v59 = vsub.f32 %v2213_v18, %v2214_v44  ;;  %v2230_v0 = vadd.f32 %v2229_v23, %v2228_v10  ;;  %v2238_v34 = vmul.f32 %v2207_v22, %v2174_v46 }
 0x146   :  { %v2226_v57 = vadd.f32 %v2225_v16, %v2223_v39  ;;  %v2240_v19 = vmul.f32 %v2219_v49, %v2171_v17  ;;  %v2241_v14 = vmul.f32 %v2221_v4, %v2174_v46  ;;  %v2243_v61 = vmul.f32 %v2224_v58, %v3726_v9 }
 0x147   :  { %v2232_v20 = vmul.f32 %v2230_v0, %v3644_v54  ;;  %v2234_v51 = vmul.f32 %v2230_v0, %v3640_v15  ;;  %v3780_v41 = vsub.f32 %v2237_v36, %v2238_v34  ;;  %v2246_v53 = vmul.f32 %v2205_v12, %v2192_v33 }
 0x148   :  { %v2227_v26 = vadd.f32 %v2226_v57, %v3729_v28  ;;  %v2242_v60 = vadd.f32 %v2241_v14, %v2240_v19  ;;  %v2247_v8 = vmul.f32 %v2207_v22, %v3742_v11  ;;  %v2249_v9 = vmul.f32 %v2189_v55, %v3640_v15 }
 0x149   :  { %v2233_v32 = vadd.f32 %v2232_v20, %v2231_v2  ;;  %v2236_v17 = vsub.f32 %v2234_v51, %v2235_v45  ;;  %v2253_v46 = vmul.f32 %v2189_v55, %v3644_v54  ;;  %v2255_v29 = vmul.f32 %v2205_v12, %v3742_v11 }
 0x14a   :  { %v2244_v6 = vadd.f32 %v2243_v61, %v2242_v60  ;;  %v2248_v24 = vadd.f32 %v2247_v8, %v2246_v53  ;;  %v2256_v56 = vmul.f32 %v2207_v22, %v2192_v33  ;;  %v2258_v28 = vmul.f32 %v2219_v49, %v2189_v55  ;;  %2318 = vst [vmem:[#allocation7] sm:$0xff] %v2227_v26 }
 0x14b   :  { %v2259_v43 = vmul.f32 %v2221_v4, %v2192_v33  ;;  %v2261_v48 = vmul.f32 %v2224_v58, %v3742_v11  ;;  %v2264_v7 = vstv %s3751_s17  ;;  %v2266_v3 = vstv %s3761_s20 }
 0x14c   :  { %v2245_v52 = vadd.f32 %v2244_v6, %v3738_v1  ;;  %v2250_v38 = vmul.f32 %v2248_v24, %v3644_v54  ;;  %v2252_v12 = vmul.f32 %v2248_v24, %v3640_v15  ;;  %v2257_v35 = vsub.f32 %v2255_v29, %v2256_v56 }
 0x14d   :  { %v2260_v40 = vadd.f32 %v2259_v43, %v2258_v28  ;;  %v2265_v21 = vmul.f32 %v2264_v7, %v2212_v13  ;;  %v2267_v22 = vmul.f32 %v2266_v3, %v2215_v59  ;;  %v2269_v5 = vstv %s3771_s21 }
 0x14e   :  { %v2251_v55 = vadd.f32 %v2250_v38, %v2249_v9  ;;  %v2254_v33 = vsub.f32 %v2252_v12, %v2253_v46  ;;  %v2270_v11 = vmul.f32 %v2269_v5, %v3758_v62  ;;  %v2272_v30 = vstv %s3753_s0  ;;  %2320 = vst [vmem:[#allocation7 + $0x8] sm:$0xff] %v2245_v52 }
 0x14f   :  { %v2262_v1 = vadd.f32 %v2261_v48, %v2260_v40  ;;  %v2268_v44 = vadd.f32 %v2267_v22, %v2265_v21  ;;  %v2273_v54 = vmul.f32 %v2272_v30, %v2212_v13  ;;  %v2274_v27 = vstv %s3773_s22 }
 0x150   :  { %v2275_v15 = vmul.f32 %v2274_v27, %v2215_v59  ;;  %v2277_v63 = vstv %s3782_s24  ;;  %v2280_v25 = vstv %s3766_s1  ;;  %v2282_v49 = vstv %s3776_s23 }
 0x151   :  { %v2263_v37 = vadd.f32 %v2262_v1, %v3756_v50  ;;  %v2271_v47 = vadd.f32 %v2270_v11, %v2268_v44  ;;  %v2278_v4 = vmul.f32 %v2277_v63, %v3758_v62  ;;  %v2281_v58 = vmul.f32 %v2280_v25, %v2212_v13 }
 0x152   :  { %v2276_v42 = vadd.f32 %v2275_v15, %v2273_v54  ;;  %v2283_v16 = vmul.f32 %v2282_v49, %v2215_v59  ;;  %v2285_v31 = vstv %s3789_s25  ;;  %v2288_v18 = vmul.f32 %v2264_v7, %v2233_v32 }
 0x153   :  { %v2286_v10 = vmul.f32 %v2285_v31, %v3758_v62  ;;  %v2289_v23 = vmul.f32 %v2266_v3, %v2236_v17  ;;  %v2291_v39 = vmul.f32 %v2269_v5, %v3780_v41  ;;  %v2293_v2 = vmul.f32 %v2272_v30, %v2233_v32  ;;  %2322 = vst [vmem:[#allocation7 + $0x10] sm:$0xff] %v2263_v37 }
 0x154   :  { %v2279_v45 = vadd.f32 %v2278_v4, %v2276_v42  ;;  %v2284_v36 = vadd.f32 %v2283_v16, %v2281_v58  ;;  %v2294_v0 = vmul.f32 %v2274_v27, %v2236_v17  ;;  %v2296_v50 = vmul.f32 %v2277_v63, %v3780_v41  ;;  %2324 = vst [vmem:[#allocation7 + $0x18] sm:$0xff] %v2271_v47 }
 0x155   :  { %v2290_v34 = vadd.f32 %v2289_v23, %v2288_v18  ;;  %v2298_v57 = vmul.f32 %v2280_v25, %v2233_v32  ;;  %v2299_v13 = vmul.f32 %v2282_v49, %v2236_v17  ;;  %v2301_v59 = vmul.f32 %v2285_v31, %v3780_v41 }
 0x156   :  { %v2287_v19 = vadd.f32 %v2286_v10, %v2284_v36  ;;  %v2295_v14 = vadd.f32 %v2294_v0, %v2293_v2  ;;  %v2303_v61 = vmul.f32 %v2264_v7, %v2251_v55  ;;  %v2304_v62 = vmul.f32 %v2266_v3, %v2254_v33  ;;  %2326 = vst [vmem:[#allocation7 + $0x20] sm:$0xff] %v2279_v45 }
 0x157   :  { %v2292_v20 = vadd.f32 %v2291_v39, %v2290_v34  ;;  %v2300_v51 = vadd.f32 %v2299_v13, %v2298_v57  ;;  %v2306_v53 = vmul.f32 %v2269_v5, %v2257_v35  ;;  %v2308_v26 = vmul.f32 %v2272_v30, %v2251_v55 }
 0x158   :  { %v2297_v60 = vadd.f32 %v2296_v50, %v2295_v14  ;;  %v2305_v8 = vadd.f32 %v2304_v62, %v2303_v61  ;;  %v2309_v9 = vmul.f32 %v2274_v27, %v2254_v33  ;;  %v2311_v46 = vmul.f32 %v2277_v63, %v2257_v35  ;;  %2328 = vst [vmem:[#allocation7 + $0x28] sm:$0xff] %v2287_v19 }
 0x159   :  { %v2302_v29 = vadd.f32 %v2301_v59, %v2300_v51  ;;  %v2313_v6 = vmul.f32 %v2280_v25, %v2251_v55  ;;  %v2314_v32 = vmul.f32 %v2282_v49, %v2254_v33  ;;  %v2316_v17 = vmul.f32 %v2285_v31, %v2257_v35  ;;  %2330 = vst [vmem:[#allocation7 + $0x30] sm:$0xff] %v2292_v20 }
 0x15a   :  { %v2307_v41 = vadd.f32 %v2306_v53, %v2305_v8  ;;  %v2310_v24 = vadd.f32 %v2309_v9, %v2308_v26  ;;  %2332 = vst [vmem:[#allocation7 + $0x38] sm:$0xff] %v2297_v60 }
 0x15b   :  { %v2315_v56 = vadd.f32 %v2314_v32, %v2313_v6  ;;  %2334 = vst [vmem:[#allocation7 + $0x40] sm:$0xff] %v2302_v29 }
 0x15c   :  { %v2312_v28 = vadd.f32 %v2311_v46, %v2310_v24  ;;  %2336 = vst [vmem:[#allocation7 + $0x48] sm:$0xff] %v2307_v41 }
 0x15d   :  { %v2317_v43 = vadd.f32 %v2316_v17, %v2315_v56 }
 0x15e   :  { %2338 = vst [vmem:[#allocation7 + $0x50] sm:$0xff] %v2312_v28 }
 0x15f   :  { %2340 = vst [vmem:[#allocation7 + $0x58] sm:$0xff] %v2317_v43 }
 0x160   :  { %2353 = dma.vmem_to_hbm [thread:$0]  %s2346_s27, 1536, %s2348_s30, [#allocation4], %s2512_s18, %s2512_s18, %s2513_s19  }
 0x161   :  { %2508 = dma.done.wait [#allocation4], 1536  }
 0x162   :  { %2509 = vsyncadd [#allocation4], 4294965760 }
 0x163   :  { %2358 = vsyncpa [#allocation3], 1 }
 0x164   :  { %2359 = vsyncpa [#allocation4], 1 }
 0x165   :  { %2360 = vsyncpa [#allocation5], 1 }

</bundles_post_ra>
